<compile_context>
chip_gen: v7x
topology: tpu7x:2x2x1
jax: 0.10.0
libtpu: 0.0.40
codegen_flags: <defaults>
</compile_context>

<pallas_src>
import functools
import math

import jax
import jax.numpy as jnp
from jax.experimental import pallas as pl
from jax.experimental.pallas import tpu as pltpu


# ----------------------------------------------------------------------------
# Pallas kernels
# ----------------------------------------------------------------------------
def _bilstm_kernel(pre_ref, m_ref, whh_ref, h0_ref, c0_ref, out_ref,
                   h_sc, c_sc, *, H, K):
    """Fused bidirectional masked-LSTM recurrence.

    grid = (2, T // K):
      axis 0 = direction (0=forward, 1=backward)  -> "parallel"
      axis 1 = time block (K steps per grid step) -> "arbitrary" (sequential)

    pre_ref : (K, B, 4H)  pre-computed x @ W_ih + b for this time block
    m_ref   : (K, B, 1)   per-timestep mask (broadcast over H in-kernel)
    whh_ref : (H, 4H)     recurrent weights for this direction
    out_ref : (K, B, H)   hidden outputs (written at source-time row order)
    h_sc/c_sc : (B, H)    VMEM-resident recurrent state across time blocks
    """
    d = pl.program_id(0)  # direction

    @pl.when(pl.program_id(1) == 0)
    def _():
        h_sc[...] = h0_ref[...]
        c_sc[...] = c0_ref[...]

    whh = whh_ref[...]  # (H, 4H), stays resident across the time loop

    def step(j, carry):
        h, c = carry
        # Within-block row: j for forward, K-1-j for backward (time reversal).
        r = j + d * (K - 1 - 2 * j)

        pre = pre_ref[r]          # (B, 4H) = x@Wih + b  (hoisted out of loop)
        m = m_ref[r]              # (B, 1)

        gates = pre + jnp.dot(h, whh, preferred_element_type=jnp.float32)
        i_g = jax.nn.sigmoid(gates[:, 0 * H:1 * H])
        f_g = jax.nn.sigmoid(gates[:, 1 * H:2 * H])
        g_g = jnp.tanh(gates[:, 2 * H:3 * H])
        o_g = jax.nn.sigmoid(gates[:, 3 * H:4 * H])

        c_next = f_g * c + i_g * g_g
        h_next = o_g * jnp.tanh(c_next)

        # mask: 1 -> take new state, 0 -> carry previous state (padded step)
        h_next = m * h_next + (1.0 - m) * h
        c_next = m * c_next + (1.0 - m) * c

        out_ref[r] = h_next
        return h_next, c_next

    h, c = jax.lax.fori_loop(0, K, step, (h_sc[...], c_sc[...]), unroll=True)
    h_sc[...] = h
    c_sc[...] = c


def _highway_kernel(xf_ref, xb_ref, prev_ref, w_ref, b_ref, out_ref):
    """Highway gate fused with the forward/backward concat.

    out = g * [xf, xb] + (1 - g) * prev,  g = sigmoid([xf, xb] @ W + b)
    """
    xf = xf_ref[...]                                   # (R, H)
    xb = xb_ref[...]                                   # (R, H)
    x = jnp.concatenate([xf, xb], axis=-1)             # (R, 2H)
    prev = prev_ref[...]                               # (R, 2H)
    g = jax.nn.sigmoid(
        jnp.dot(x, w_ref[...], preferred_element_type=jnp.float32) + b_ref[...])
    out_ref[...] = g * x + (1.0 - g) * prev


# ----------------------------------------------------------------------------
# Wrappers
# ----------------------------------------------------------------------------
def run_bilstm_layer(pregates, masks, whh, h0, c0, *, K):
    """Fused bidirectional layer.

    pregates : (2, T, B, 4H)   x @ W_ih + b, per direction, original time order
    masks    : (T, B, 1)
    whh      : (2, H, 4H)
    h0, c0   : (2, B, H)
    returns  : (2, T, B, H)    direction-major hidden outputs
    """
    _, T, B, G = pregates.shape
    H = G // 4
    nb = T // K  # number of time blocks

    # Time-block index: tb for forward, nb-1-tb for backward (pure index math).
    tmap4 = lambda d, tb: (d, tb + d * (nb - 1 - 2 * tb), 0, 0)
    tmap3 = lambda d, tb: (tb + d * (nb - 1 - 2 * tb), 0, 0)
    dmap = lambda d, tb: (d, 0, 0)

    return pl.pallas_call(
        functools.partial(_bilstm_kernel, H=H, K=K),
        out_shape=jax.ShapeDtypeStruct((2, T, B, H), jnp.float32),
        grid=(2, nb),
        in_specs=[
            pl.BlockSpec((None, K, B, G), tmap4),   # pregates (dir squeezed)
            pl.BlockSpec((K, B, 1), tmap3),         # masks (broadcast in-kernel)
            pl.BlockSpec((None, H, G), dmap),       # W_hh
            pl.BlockSpec((None, B, H), dmap),       # h0
            pl.BlockSpec((None, B, H), dmap),       # c0
        ],
        out_specs=pl.BlockSpec((None, K, B, H), tmap4),
        scratch_shapes=[pltpu.VMEM((B, H), jnp.float32),
                        pltpu.VMEM((B, H), jnp.float32)],
        compiler_params=pltpu.CompilerParams(
            # direction axis independent (2 TCs on v7x), time axis sequential
            dimension_semantics=("parallel", "arbitrary")),
    )(pregates, masks, whh, h0, c0)


def _pick_row_block(n, max_rows=512):
    """Largest multiple-of-8 divisor of n that is <= max_rows (or n itself)."""
    if n <= max_rows:
        return n
    for r in range(max_rows - max_rows % 8, 0, -8):
        if n % r == 0:
            return r
    return n


def run_highway(out_dmajor, prev, w, b):
    """Highway combine (and concat of the two directions), lane-dense tiles.

    out_dmajor : (2, T, B, H)  BiLSTM output, direction-major
    prev       : (T, B, 2H)    previous layer's input
    returns    : (T, B, 2H)
    """
    _, T, B, H = out_dmajor.shape
    N = T * B
    xf = out_dmajor[0].reshape(N, H)
    xb = out_dmajor[1].reshape(N, H)
    prev2 = prev.reshape(N, 2 * H)
    R = _pick_row_block(N)

    out = pl.pallas_call(
        _highway_kernel,
        out_shape=jax.ShapeDtypeStruct((N, 2 * H), jnp.float32),
        grid=(N // R,),
        in_specs=[
            pl.BlockSpec((R, H), lambda i: (i, 0)),
            pl.BlockSpec((R, H), lambda i: (i, 0)),
            pl.BlockSpec((R, 2 * H), lambda i: (i, 0)),
            pl.BlockSpec((2 * H, 2 * H), lambda i: (0, 0)),
            pl.BlockSpec((1, 2 * H), lambda i: (0, 0)),
        ],
        out_specs=pl.BlockSpec((R, 2 * H), lambda i: (i, 0)),
        compiler_params=pltpu.CompilerParams(
            dimension_semantics=("parallel",)),
    )(xf, xb, prev2, w, b)
    return out.reshape(T, B, 2 * H)


# ----------------------------------------------------------------------------
# Parameter construction (deterministic, synthetic)
# ----------------------------------------------------------------------------
def xavier_uniform(key, shape):
    fan_in, fan_out = shape[-2], shape[-1]
    bound = jnp.sqrt(6.0 / (fan_in + fan_out))
    return jax.random.uniform(key, shape, jnp.float32, -bound, bound)


def make_params(key, input_size, hidden_size, num_layers):
    params = {"layers": [], "highway": []}
    H = hidden_size
    for layer in range(num_layers):
        D = input_size if layer == 0 else 2 * H
        keys = jax.random.split(jax.random.fold_in(key, layer), 8)
        params["layers"].append({
            # leading axis = direction (0=forward, 1=backward)
            "wih": jnp.stack([xavier_uniform(keys[0], (D, 4 * H)),
                              xavier_uniform(keys[4], (D, 4 * H))]),
            "whh": jnp.stack([xavier_uniform(keys[1], (H, 4 * H)),
                              xavier_uniform(keys[5], (H, 4 * H))]),
            "bias": jnp.stack([0.1 * jax.random.normal(keys[2], (4 * H,)),
                               0.1 * jax.random.normal(keys[6], (4 * H,))]),
            # nn.Parameter(torch.Tensor(2, H)): row 0 = h0, row 1 = c0
            "initial": jnp.stack([xavier_uniform(keys[3], (2, H)),
                                  xavier_uniform(keys[7], (2, H))]),
        })
        if layer > 0:
            hkeys = jax.random.split(jax.random.fold_in(key, 1000 + layer), 2)
            params["highway"].append({
                "w": xavier_uniform(hkeys[0], (2 * H, 2 * H)),  # (in, out)
                "b": 0.1 * jax.random.normal(hkeys[1], (1, 2 * H)),
            })
    return params


# ----------------------------------------------------------------------------
# Full forward pass (mirrors Highway_Concat_BiLSTM.forward, batch_first=False)
# ----------------------------------------------------------------------------
def highway_concat_bilstm_forward(params, x, masks, hidden_size, num_layers,
                                  time_block=8):
    T, B, _ = x.shape
    H = hidden_size
    K = math.gcd(T, time_block)          # timesteps per grid step (divides T)
    masks = masks.astype(jnp.float32)    # (T, B, 1)

    outputs = []
    layer_input = x
    output = None
    for layer in range(num_layers):
        lp = params["layers"][layer]

        # Hoisted input projection: one batched matmul over all timesteps and
        # both directions (the non-recurrent part of the LSTM gates).
        pregates = (jnp.einsum("tbi,dig->dtbg", layer_input, lp["wih"],
                               preferred_element_type=jnp.float32)
                    + lp["bias"][:, None, None, :])            # (2, T, B, 4H)

        h0 = jnp.broadcast_to(lp["initial"][:, 0:1, :], (2, B, H))
        c0 = jnp.broadcast_to(lp["initial"][:, 1:2, :], (2, B, H))

        out_dmajor = run_bilstm_layer(pregates, masks, lp["whh"], h0, c0, K=K)

        # F.dropout with p=0 / eval mode: identity.
        if layer > 0:
            hp = params["highway"][layer - 1]
            # Highway gate; also fuses the forward/backward concat.
            output = run_highway(out_dmajor, layer_input, hp["w"], hp["b"])
        else:
            # No highway on layer 0: materialize the concatenated output once.
            output = jnp.concatenate([out_dmajor[0], out_dmajor[1]], axis=-1)

        layer_input = output
        outputs.append(output)

    return output, outputs


# ----------------------------------------------------------------------------
# Pure-JAX reference (same math, lax.scan recurrence) for a correctness check
# ----------------------------------------------------------------------------
def reference_forward(params, x, masks, hidden_size, num_layers):
    T, B, _ = x.shape
    H = hidden_size
    m = masks.astype(jnp.float32)

    def cell_scan(x_seq, m_seq, wih, whh, bias, h0, c0):
        def step(carry, inp):
            h, c = carry
            x_t, m_t = inp
            gates = x_t @ wih + h @ whh + bias
            i_g = jax.nn.sigmoid(gates[:, :H])
            f_g = jax.nn.sigmoid(gates[:, H:2 * H])
            g_g = jnp.tanh(gates[:, 2 * H:3 * H])
            o_g = jax.nn.sigmoid(gates[:, 3 * H:])
            c_n = f_g * c + i_g * g_g
            h_n = o_g * jnp.tanh(c_n)
            h_n = m_t * h_n + (1.0 - m_t) * h
            c_n = m_t * c_n + (1.0 - m_t) * c
            return (h_n, c_n), h_n
        _, hs = jax.lax.scan(step, (h0, c0), (x_seq, m_seq))
        return hs

    layer_input = x
    outputs = []
    out = None
    for layer in range(num_layers):
        lp = params["layers"][layer]
        h0f = jnp.broadcast_to(lp["initial"][0, 0], (B, H))
        c0f = jnp.broadcast_to(lp["initial"][0, 1], (B, H))
        h0b = jnp.broadcast_to(lp["initial"][1, 0], (B, H))
        c0b = jnp.broadcast_to(lp["initial"][1, 1], (B, H))
        f = cell_scan(layer_input, m, lp["wih"][0], lp["whh"][0],
                      lp["bias"][0], h0f, c0f)
        b = cell_scan(layer_input[::-1], m[::-1], lp["wih"][1], lp["whh"][1],
                      lp["bias"][1], h0b, c0b)[::-1]
        out = jnp.concatenate([f, b], axis=-1)
        if layer > 0:
            hp = params["highway"][layer - 1]
            g = jax.nn.sigmoid(out @ hp["w"] + hp["b"])
            out = g * out + (1.0 - g) * layer_input
        layer_input = out
        outputs.append(out)
    return out, outputs


# ----------------------------------------------------------------------------
if __name__ == "__main__":
    T, B = 8, 2
    INPUT_SIZE, HIDDEN, NUM_LAYERS = 32, 32, 2

    root = jax.random.PRNGKey(0)
    k_x, k_p = jax.random.split(root)

    x = jax.random.normal(k_x, (T, B, INPUT_SIZE), jnp.float32)
    # mask: ones, except the last two timesteps of batch element 1 are padding
    masks = jnp.ones((T, B, 1), jnp.float32)
    masks = masks.at[T - 2:, 1, 0].set(0.0)

    params = make_params(k_p, INPUT_SIZE, HIDDEN, NUM_LAYERS)

    fwd = jax.jit(functools.partial(highway_concat_bilstm_forward,
                                    hidden_size=HIDDEN, num_layers=NUM_LAYERS))
    output, outputs = fwd(params, x, masks)

    jax.block_until_ready(output)
    for o in outputs:
        jax.block_until_ready(o)

    assert output.shape == (T, B, 2 * HIDDEN)
    assert len(outputs) == NUM_LAYERS

    # Numerical check against the pure-JAX reference.
    ref_out, ref_outputs = reference_forward(params, x, masks, HIDDEN, NUM_LAYERS)
    jax.block_until_ready(ref_out)
    assert jnp.allclose(output, ref_out, atol=1e-4, rtol=1e-4)
    for o, r in zip(outputs, ref_outputs):
        assert jnp.allclose(o, r, atol=1e-4, rtol=1e-4)

    print("KERNEL_OK")
</pallas_src>

<mosaic_0001>
module attributes {stable_mosaic.version = 11 : i64} {
  func.func @_bilstm_kernel(%arg0: i32, %arg1: i32, %arg2: memref<1x8x2x128xf32, #tpu.memory_space<vmem>>, %arg3: memref<8x2x1xf32, #tpu.memory_space<vmem>>, %arg4: memref<1x32x128xf32, #tpu.memory_space<vmem>>, %arg5: memref<1x2x32xf32, #tpu.memory_space<vmem>>, %arg6: memref<1x2x32xf32, #tpu.memory_space<vmem>>, %arg7: memref<1x8x2x32xf32, #tpu.memory_space<vmem>>, %arg8: memref<2x32xf32, #tpu.memory_space<vmem>>, %arg9: memref<2x32xf32, #tpu.memory_space<vmem>>) attributes {dimension_semantics = [#tpu.dimension_semantics<parallel>, #tpu.dimension_semantics<arbitrary>], iteration_bounds = array<i64: 2, 1>, scalar_prefetch = 0 : i64, scratch_operands = 2 : i64, tpu.core_type = #tpu.core_type<tc>, window_params = [{transform_indices = @transform_0, window_bounds = array<i64: 1, 8, 2, 128>}, {transform_indices = @transform_1, window_bounds = array<i64: 8, 2, 1>}, {transform_indices = @transform_2, window_bounds = array<i64: 1, 32, 128>}, {transform_indices = @transform_3, window_bounds = array<i64: 1, 2, 32>}, {transform_indices = @transform_4, window_bounds = array<i64: 1, 2, 32>}, {transform_indices = @transform_5, window_bounds = array<i64: 1, 8, 2, 32>}]} {
    %c0_i32 = arith.constant 0 : i32
    %0 = arith.cmpi eq, %arg1, %c0_i32 : i32
    %1 = arith.extui %0 : i1 to i32
    %c0_i32_0 = arith.constant 0 : i32
    %2 = arith.cmpi ne, %1, %c0_i32_0 : i32
    scf.if %2 {
      %c0_139 = arith.constant 0 : index
      %c0_140 = arith.constant 0 : index
      %c0_141 = arith.constant 0 : index
      %449 = vector.load %arg5[%c0_139, %c0_140, %c0_141] : memref<1x2x32xf32, #tpu.memory_space<vmem>>, vector<1x2x32xf32>
      %450 = vector.shape_cast %449 : vector<1x2x32xf32> to vector<2x32xf32>
      %c0_142 = arith.constant 0 : index
      %c0_143 = arith.constant 0 : index
      %451 = vector.load %arg8[%c0_142, %c0_143] : memref<2x32xf32, #tpu.memory_space<vmem>>, vector<2x32xf32>
      tpu.vector_store %arg8[%c0_142, %c0_143], %450 {strides = array<i32>} : memref<2x32xf32, #tpu.memory_space<vmem>>, vector<2x32xf32>,
      %c0_144 = arith.constant 0 : index
      %c0_145 = arith.constant 0 : index
      %c0_146 = arith.constant 0 : index
      %452 = vector.load %arg6[%c0_144, %c0_145, %c0_146] : memref<1x2x32xf32, #tpu.memory_space<vmem>>, vector<1x2x32xf32>
      %453 = vector.shape_cast %452 : vector<1x2x32xf32> to vector<2x32xf32>
      %c0_147 = arith.constant 0 : index
      %c0_148 = arith.constant 0 : index
      %454 = vector.load %arg9[%c0_147, %c0_148] : memref<2x32xf32, #tpu.memory_space<vmem>>, vector<2x32xf32>
      tpu.vector_store %arg9[%c0_147, %c0_148], %453 {strides = array<i32>} : memref<2x32xf32, #tpu.memory_space<vmem>>, vector<2x32xf32>,
    } else {
    }
    %c0 = arith.constant 0 : index
    %c0_1 = arith.constant 0 : index
    %c0_2 = arith.constant 0 : index
    %3 = vector.load %arg4[%c0, %c0_1, %c0_2] : memref<1x32x128xf32, #tpu.memory_space<vmem>>, vector<1x32x128xf32>
    %4 = vector.shape_cast %3 : vector<1x32x128xf32> to vector<32x128xf32>
    %c0_3 = arith.constant 0 : index
    %c0_4 = arith.constant 0 : index
    %5 = vector.load %arg8[%c0_3, %c0_4] : memref<2x32xf32, #tpu.memory_space<vmem>>, vector<2x32xf32>
    %c0_5 = arith.constant 0 : index
    %c0_6 = arith.constant 0 : index
    %6 = vector.load %arg9[%c0_5, %c0_6] : memref<2x32xf32, #tpu.memory_space<vmem>>, vector<2x32xf32>
    %c0_i32_7 = arith.constant 0 : i32
    %c2_i32 = arith.constant 2 : i32
    %7 = arith.muli %c2_i32, %c0_i32_7 : i32
    %c7_i32 = arith.constant 7 : i32
    %8 = arith.subi %c7_i32, %7 : i32
    %9 = arith.muli %arg0, %8 : i32
    %10 = arith.addi %c0_i32_7, %9 : i32
    %c0_8 = arith.constant 0 : index
    %11 = arith.index_cast %10 : i32 to index
    %c0_9 = arith.constant 0 : index
    %c0_10 = arith.constant 0 : index
    %12 = vector.load %arg2[%c0_8, %11, %c0_9, %c0_10] : memref<1x8x2x128xf32, #tpu.memory_space<vmem>>, vector<1x1x2x128xf32>
    %13 = vector.shape_cast %12 : vector<1x1x2x128xf32> to vector<2x128xf32>
    %14 = arith.index_cast %10 : i32 to index
    %c0_11 = arith.constant 0 : index
    %c0_12 = arith.constant 0 : index
    %15 = vector.load %arg3[%14, %c0_11, %c0_12] : memref<8x2x1xf32, #tpu.memory_space<vmem>>, vector<1x2x1xf32>
    %16 = vector.shape_cast %15 : vector<1x2x1xf32> to vector<2x1xf32>
    %cst = arith.constant dense<0.000000e+00> : vector<2x128xf32>
    %17 = tpu.matmul %5, %4, %cst {dimension_numbers = #tpu.dot_dimension_numbers<[1], [0], [0], [1], [0, 0, 1, 1], [], []>} : vector<2x32xf32>, vector<32x128xf32>, vector<2x128xf32> -> vector<2x128xf32>
    %18 = arith.addf %13, %17 : vector<2x128xf32>
    %19 = vector.extract_strided_slice %18 {offsets = [0, 0], sizes = [2, 32], strides = [1, 1]} : vector<2x128xf32> to vector<2x32xf32>
    %20 = arith.negf %19 : vector<2x32xf32>
    %21 = math.exp %20 : vector<2x32xf32>
    %cst_13 = arith.constant 1.000000e+00 : f32
    %22 = vector.broadcast %cst_13 : f32 to vector<2x32xf32>
    %23 = arith.addf %22, %21 : vector<2x32xf32>
    %24 = arith.divf %22, %23 : vector<2x32xf32>
    %25 = vector.extract_strided_slice %18 {offsets = [0, 32], sizes = [2, 32], strides = [1, 1]} : vector<2x128xf32> to vector<2x32xf32>
    %26 = arith.negf %25 : vector<2x32xf32>
    %27 = math.exp %26 : vector<2x32xf32>
    %cst_14 = arith.constant 1.000000e+00 : f32
    %28 = vector.broadcast %cst_14 : f32 to vector<2x32xf32>
    %29 = arith.addf %28, %27 : vector<2x32xf32>
    %30 = arith.divf %28, %29 : vector<2x32xf32>
    %31 = vector.extract_strided_slice %18 {offsets = [0, 64], sizes = [2, 32], strides = [1, 1]} : vector<2x128xf32> to vector<2x32xf32>
    %32 = math.tanh %31 : vector<2x32xf32>
    %33 = vector.extract_strided_slice %18 {offsets = [0, 96], sizes = [2, 32], strides = [1, 1]} : vector<2x128xf32> to vector<2x32xf32>
    %34 = arith.negf %33 : vector<2x32xf32>
    %35 = math.exp %34 : vector<2x32xf32>
    %cst_15 = arith.constant 1.000000e+00 : f32
    %36 = vector.broadcast %cst_15 : f32 to vector<2x32xf32>
    %37 = arith.addf %36, %35 : vector<2x32xf32>
    %38 = arith.divf %36, %37 : vector<2x32xf32>
    %39 = arith.mulf %30, %6 : vector<2x32xf32>
    %40 = arith.mulf %24, %32 : vector<2x32xf32>
    %41 = arith.addf %39, %40 : vector<2x32xf32>
    %42 = math.tanh %41 : vector<2x32xf32>
    %43 = arith.mulf %38, %42 : vector<2x32xf32>
    %44 = vector.broadcast %16 : vector<2x1xf32> to vector<2x32xf32>
    %45 = arith.mulf %44, %43 : vector<2x32xf32>
    %cst_16 = arith.constant 1.000000e+00 : f32
    %46 = vector.broadcast %cst_16 : f32 to vector<2x1xf32>
    %47 = arith.subf %46, %16 : vector<2x1xf32>
    %48 = vector.broadcast %47 : vector<2x1xf32> to vector<2x32xf32>
    %49 = arith.mulf %48, %5 : vector<2x32xf32>
    %50 = arith.addf %45, %49 : vector<2x32xf32>
    %51 = vector.broadcast %16 : vector<2x1xf32> to vector<2x32xf32>
    %52 = arith.mulf %51, %41 : vector<2x32xf32>
    %cst_17 = arith.constant 1.000000e+00 : f32
    %53 = vector.broadcast %cst_17 : f32 to vector<2x1xf32>
    %54 = arith.subf %53, %16 : vector<2x1xf32>
    %55 = vector.broadcast %54 : vector<2x1xf32> to vector<2x32xf32>
    %56 = arith.mulf %55, %6 : vector<2x32xf32>
    %57 = arith.addf %52, %56 : vector<2x32xf32>
    %c0_18 = arith.constant 0 : index
    %58 = arith.index_cast %10 : i32 to index
    %c0_19 = arith.constant 0 : index
    %c0_20 = arith.constant 0 : index
    %59 = vector.load %arg7[%c0_18, %58, %c0_19, %c0_20] : memref<1x8x2x32xf32, #tpu.memory_space<vmem>>, vector<1x1x2x32xf32>
    %60 = vector.shape_cast %59 : vector<1x1x2x32xf32> to vector<2x32xf32>
    %61 = vector.shape_cast %50 : vector<2x32xf32> to vector<1x1x2x32xf32>
    tpu.vector_store %arg7[%c0_18, %58, %c0_19, %c0_20], %61 {strides = array<i32>} : memref<1x8x2x32xf32, #tpu.memory_space<vmem>>, vector<1x1x2x32xf32>,
    %c1_i32 = arith.constant 1 : i32
    %c2_i32_21 = arith.constant 2 : i32
    %62 = arith.muli %c2_i32_21, %c1_i32 : i32
    %c7_i32_22 = arith.constant 7 : i32
    %63 = arith.subi %c7_i32_22, %62 : i32
    %64 = arith.muli %arg0, %63 : i32
    %65 = arith.addi %c1_i32, %64 : i32
    %c0_23 = arith.constant 0 : index
    %66 = arith.index_cast %65 : i32 to index
    %c0_24 = arith.constant 0 : index
    %c0_25 = arith.constant 0 : index
    %67 = vector.load %arg2[%c0_23, %66, %c0_24, %c0_25] : memref<1x8x2x128xf32, #tpu.memory_space<vmem>>, vector<1x1x2x128xf32>
    %68 = vector.shape_cast %67 : vector<1x1x2x128xf32> to vector<2x128xf32>
    %69 = arith.index_cast %65 : i32 to index
    %c0_26 = arith.constant 0 : index
    %c0_27 = arith.constant 0 : index
    %70 = vector.load %arg3[%69, %c0_26, %c0_27] : memref<8x2x1xf32, #tpu.memory_space<vmem>>, vector<1x2x1xf32>
    %71 = vector.shape_cast %70 : vector<1x2x1xf32> to vector<2x1xf32>
    %cst_28 = arith.constant dense<0.000000e+00> : vector<2x128xf32>
    %72 = tpu.matmul %50, %4, %cst_28 {dimension_numbers = #tpu.dot_dimension_numbers<[1], [0], [0], [1], [0, 0, 1, 1], [], []>} : vector<2x32xf32>, vector<32x128xf32>, vector<2x128xf32> -> vector<2x128xf32>
    %73 = arith.addf %68, %72 : vector<2x128xf32>
    %74 = vector.extract_strided_slice %73 {offsets = [0, 0], sizes = [2, 32], strides = [1, 1]} : vector<2x128xf32> to vector<2x32xf32>
    %75 = arith.negf %74 : vector<2x32xf32>
    %76 = math.exp %75 : vector<2x32xf32>
    %cst_29 = arith.constant 1.000000e+00 : f32
    %77 = vector.broadcast %cst_29 : f32 to vector<2x32xf32>
    %78 = arith.addf %77, %76 : vector<2x32xf32>
    %79 = arith.divf %77, %78 : vector<2x32xf32>
    %80 = vector.extract_strided_slice %73 {offsets = [0, 32], sizes = [2, 32], strides = [1, 1]} : vector<2x128xf32> to vector<2x32xf32>
    %81 = arith.negf %80 : vector<2x32xf32>
    %82 = math.exp %81 : vector<2x32xf32>
    %cst_30 = arith.constant 1.000000e+00 : f32
    %83 = vector.broadcast %cst_30 : f32 to vector<2x32xf32>
    %84 = arith.addf %83, %82 : vector<2x32xf32>
    %85 = arith.divf %83, %84 : vector<2x32xf32>
    %86 = vector.extract_strided_slice %73 {offsets = [0, 64], sizes = [2, 32], strides = [1, 1]} : vector<2x128xf32> to vector<2x32xf32>
    %87 = math.tanh %86 : vector<2x32xf32>
    %88 = vector.extract_strided_slice %73 {offsets = [0, 96], sizes = [2, 32], strides = [1, 1]} : vector<2x128xf32> to vector<2x32xf32>
    %89 = arith.negf %88 : vector<2x32xf32>
    %90 = math.exp %89 : vector<2x32xf32>
    %cst_31 = arith.constant 1.000000e+00 : f32
    %91 = vector.broadcast %cst_31 : f32 to vector<2x32xf32>
    %92 = arith.addf %91, %90 : vector<2x32xf32>
    %93 = arith.divf %91, %92 : vector<2x32xf32>
    %94 = arith.mulf %85, %57 : vector<2x32xf32>
    %95 = arith.mulf %79, %87 : vector<2x32xf32>
    %96 = arith.addf %94, %95 : vector<2x32xf32>
    %97 = math.tanh %96 : vector<2x32xf32>
    %98 = arith.mulf %93, %97 : vector<2x32xf32>
    %99 = vector.broadcast %71 : vector<2x1xf32> to vector<2x32xf32>
    %100 = arith.mulf %99, %98 : vector<2x32xf32>
    %cst_32 = arith.constant 1.000000e+00 : f32
    %101 = vector.broadcast %cst_32 : f32 to vector<2x1xf32>
    %102 = arith.subf %101, %71 : vector<2x1xf32>
    %103 = vector.broadcast %102 : vector<2x1xf32> to vector<2x32xf32>
    %104 = arith.mulf %103, %50 : vector<2x32xf32>
    %105 = arith.addf %100, %104 : vector<2x32xf32>
    %106 = vector.broadcast %71 : vector<2x1xf32> to vector<2x32xf32>
    %107 = arith.mulf %106, %96 : vector<2x32xf32>
    %cst_33 = arith.constant 1.000000e+00 : f32
    %108 = vector.broadcast %cst_33 : f32 to vector<2x1xf32>
    %109 = arith.subf %108, %71 : vector<2x1xf32>
    %110 = vector.broadcast %109 : vector<2x1xf32> to vector<2x32xf32>
    %111 = arith.mulf %110, %57 : vector<2x32xf32>
    %112 = arith.addf %107, %111 : vector<2x32xf32>
    %c0_34 = arith.constant 0 : index
    %113 = arith.index_cast %65 : i32 to index
    %c0_35 = arith.constant 0 : index
    %c0_36 = arith.constant 0 : index
    %114 = vector.load %arg7[%c0_34, %113, %c0_35, %c0_36] : memref<1x8x2x32xf32, #tpu.memory_space<vmem>>, vector<1x1x2x32xf32>
    %115 = vector.shape_cast %114 : vector<1x1x2x32xf32> to vector<2x32xf32>
    %116 = vector.shape_cast %105 : vector<2x32xf32> to vector<1x1x2x32xf32>
    tpu.vector_store %arg7[%c0_34, %113, %c0_35, %c0_36], %116 {strides = array<i32>} : memref<1x8x2x32xf32, #tpu.memory_space<vmem>>, vector<1x1x2x32xf32>,
    %c2_i32_37 = arith.constant 2 : i32
    %c2_i32_38 = arith.constant 2 : i32
    %117 = arith.muli %c2_i32_38, %c2_i32_37 : i32
    %c7_i32_39 = arith.constant 7 : i32
    %118 = arith.subi %c7_i32_39, %117 : i32
    %119 = arith.muli %arg0, %118 : i32
    %120 = arith.addi %c2_i32_37, %119 : i32
    %c0_40 = arith.constant 0 : index
    %121 = arith.index_cast %120 : i32 to index
    %c0_41 = arith.constant 0 : index
    %c0_42 = arith.constant 0 : index
    %122 = vector.load %arg2[%c0_40, %121, %c0_41, %c0_42] : memref<1x8x2x128xf32, #tpu.memory_space<vmem>>, vector<1x1x2x128xf32>
    %123 = vector.shape_cast %122 : vector<1x1x2x128xf32> to vector<2x128xf32>
    %124 = arith.index_cast %120 : i32 to index
    %c0_43 = arith.constant 0 : index
    %c0_44 = arith.constant 0 : index
    %125 = vector.load %arg3[%124, %c0_43, %c0_44] : memref<8x2x1xf32, #tpu.memory_space<vmem>>, vector<1x2x1xf32>
    %126 = vector.shape_cast %125 : vector<1x2x1xf32> to vector<2x1xf32>
    %cst_45 = arith.constant dense<0.000000e+00> : vector<2x128xf32>
    %127 = tpu.matmul %105, %4, %cst_45 {dimension_numbers = #tpu.dot_dimension_numbers<[1], [0], [0], [1], [0, 0, 1, 1], [], []>} : vector<2x32xf32>, vector<32x128xf32>, vector<2x128xf32> -> vector<2x128xf32>
    %128 = arith.addf %123, %127 : vector<2x128xf32>
    %129 = vector.extract_strided_slice %128 {offsets = [0, 0], sizes = [2, 32], strides = [1, 1]} : vector<2x128xf32> to vector<2x32xf32>
    %130 = arith.negf %129 : vector<2x32xf32>
    %131 = math.exp %130 : vector<2x32xf32>
    %cst_46 = arith.constant 1.000000e+00 : f32
    %132 = vector.broadcast %cst_46 : f32 to vector<2x32xf32>
    %133 = arith.addf %132, %131 : vector<2x32xf32>
    %134 = arith.divf %132, %133 : vector<2x32xf32>
    %135 = vector.extract_strided_slice %128 {offsets = [0, 32], sizes = [2, 32], strides = [1, 1]} : vector<2x128xf32> to vector<2x32xf32>
    %136 = arith.negf %135 : vector<2x32xf32>
    %137 = math.exp %136 : vector<2x32xf32>
    %cst_47 = arith.constant 1.000000e+00 : f32
    %138 = vector.broadcast %cst_47 : f32 to vector<2x32xf32>
    %139 = arith.addf %138, %137 : vector<2x32xf32>
    %140 = arith.divf %138, %139 : vector<2x32xf32>
    %141 = vector.extract_strided_slice %128 {offsets = [0, 64], sizes = [2, 32], strides = [1, 1]} : vector<2x128xf32> to vector<2x32xf32>
    %142 = math.tanh %141 : vector<2x32xf32>
    %143 = vector.extract_strided_slice %128 {offsets = [0, 96], sizes = [2, 32], strides = [1, 1]} : vector<2x128xf32> to vector<2x32xf32>
    %144 = arith.negf %143 : vector<2x32xf32>
    %145 = math.exp %144 : vector<2x32xf32>
    %cst_48 = arith.constant 1.000000e+00 : f32
    %146 = vector.broadcast %cst_48 : f32 to vector<2x32xf32>
    %147 = arith.addf %146, %145 : vector<2x32xf32>
    %148 = arith.divf %146, %147 : vector<2x32xf32>
    %149 = arith.mulf %140, %112 : vector<2x32xf32>
    %150 = arith.mulf %134, %142 : vector<2x32xf32>
    %151 = arith.addf %149, %150 : vector<2x32xf32>
    %152 = math.tanh %151 : vector<2x32xf32>
    %153 = arith.mulf %148, %152 : vector<2x32xf32>
    %154 = vector.broadcast %126 : vector<2x1xf32> to vector<2x32xf32>
    %155 = arith.mulf %154, %153 : vector<2x32xf32>
    %cst_49 = arith.constant 1.000000e+00 : f32
    %156 = vector.broadcast %cst_49 : f32 to vector<2x1xf32>
    %157 = arith.subf %156, %126 : vector<2x1xf32>
    %158 = vector.broadcast %157 : vector<2x1xf32> to vector<2x32xf32>
    %159 = arith.mulf %158, %105 : vector<2x32xf32>
    %160 = arith.addf %155, %159 : vector<2x32xf32>
    %161 = vector.broadcast %126 : vector<2x1xf32> to vector<2x32xf32>
    %162 = arith.mulf %161, %151 : vector<2x32xf32>
    %cst_50 = arith.constant 1.000000e+00 : f32
    %163 = vector.broadcast %cst_50 : f32 to vector<2x1xf32>
    %164 = arith.subf %163, %126 : vector<2x1xf32>
    %165 = vector.broadcast %164 : vector<2x1xf32> to vector<2x32xf32>
    %166 = arith.mulf %165, %112 : vector<2x32xf32>
    %167 = arith.addf %162, %166 : vector<2x32xf32>
    %c0_51 = arith.constant 0 : index
    %168 = arith.index_cast %120 : i32 to index
    %c0_52 = arith.constant 0 : index
    %c0_53 = arith.constant 0 : index
    %169 = vector.load %arg7[%c0_51, %168, %c0_52, %c0_53] : memref<1x8x2x32xf32, #tpu.memory_space<vmem>>, vector<1x1x2x32xf32>
    %170 = vector.shape_cast %169 : vector<1x1x2x32xf32> to vector<2x32xf32>
    %171 = vector.shape_cast %160 : vector<2x32xf32> to vector<1x1x2x32xf32>
    tpu.vector_store %arg7[%c0_51, %168, %c0_52, %c0_53], %171 {strides = array<i32>} : memref<1x8x2x32xf32, #tpu.memory_space<vmem>>, vector<1x1x2x32xf32>,
    %c3_i32 = arith.constant 3 : i32
    %c2_i32_54 = arith.constant 2 : i32
    %172 = arith.muli %c2_i32_54, %c3_i32 : i32
    %c7_i32_55 = arith.constant 7 : i32
    %173 = arith.subi %c7_i32_55, %172 : i32
    %174 = arith.muli %arg0, %173 : i32
    %175 = arith.addi %c3_i32, %174 : i32
    %c0_56 = arith.constant 0 : index
    %176 = arith.index_cast %175 : i32 to index
    %c0_57 = arith.constant 0 : index
    %c0_58 = arith.constant 0 : index
    %177 = vector.load %arg2[%c0_56, %176, %c0_57, %c0_58] : memref<1x8x2x128xf32, #tpu.memory_space<vmem>>, vector<1x1x2x128xf32>
    %178 = vector.shape_cast %177 : vector<1x1x2x128xf32> to vector<2x128xf32>
    %179 = arith.index_cast %175 : i32 to index
    %c0_59 = arith.constant 0 : index
    %c0_60 = arith.constant 0 : index
    %180 = vector.load %arg3[%179, %c0_59, %c0_60] : memref<8x2x1xf32, #tpu.memory_space<vmem>>, vector<1x2x1xf32>
    %181 = vector.shape_cast %180 : vector<1x2x1xf32> to vector<2x1xf32>
    %cst_61 = arith.constant dense<0.000000e+00> : vector<2x128xf32>
    %182 = tpu.matmul %160, %4, %cst_61 {dimension_numbers = #tpu.dot_dimension_numbers<[1], [0], [0], [1], [0, 0, 1, 1], [], []>} : vector<2x32xf32>, vector<32x128xf32>, vector<2x128xf32> -> vector<2x128xf32>
    %183 = arith.addf %178, %182 : vector<2x128xf32>
    %184 = vector.extract_strided_slice %183 {offsets = [0, 0], sizes = [2, 32], strides = [1, 1]} : vector<2x128xf32> to vector<2x32xf32>
    %185 = arith.negf %184 : vector<2x32xf32>
    %186 = math.exp %185 : vector<2x32xf32>
    %cst_62 = arith.constant 1.000000e+00 : f32
    %187 = vector.broadcast %cst_62 : f32 to vector<2x32xf32>
    %188 = arith.addf %187, %186 : vector<2x32xf32>
    %189 = arith.divf %187, %188 : vector<2x32xf32>
    %190 = vector.extract_strided_slice %183 {offsets = [0, 32], sizes = [2, 32], strides = [1, 1]} : vector<2x128xf32> to vector<2x32xf32>
    %191 = arith.negf %190 : vector<2x32xf32>
    %192 = math.exp %191 : vector<2x32xf32>
    %cst_63 = arith.constant 1.000000e+00 : f32
    %193 = vector.broadcast %cst_63 : f32 to vector<2x32xf32>
    %194 = arith.addf %193, %192 : vector<2x32xf32>
    %195 = arith.divf %193, %194 : vector<2x32xf32>
    %196 = vector.extract_strided_slice %183 {offsets = [0, 64], sizes = [2, 32], strides = [1, 1]} : vector<2x128xf32> to vector<2x32xf32>
    %197 = math.tanh %196 : vector<2x32xf32>
    %198 = vector.extract_strided_slice %183 {offsets = [0, 96], sizes = [2, 32], strides = [1, 1]} : vector<2x128xf32> to vector<2x32xf32>
    %199 = arith.negf %198 : vector<2x32xf32>
    %200 = math.exp %199 : vector<2x32xf32>
    %cst_64 = arith.constant 1.000000e+00 : f32
    %201 = vector.broadcast %cst_64 : f32 to vector<2x32xf32>
    %202 = arith.addf %201, %200 : vector<2x32xf32>
    %203 = arith.divf %201, %202 : vector<2x32xf32>
    %204 = arith.mulf %195, %167 : vector<2x32xf32>
    %205 = arith.mulf %189, %197 : vector<2x32xf32>
    %206 = arith.addf %204, %205 : vector<2x32xf32>
    %207 = math.tanh %206 : vector<2x32xf32>
    %208 = arith.mulf %203, %207 : vector<2x32xf32>
    %209 = vector.broadcast %181 : vector<2x1xf32> to vector<2x32xf32>
    %210 = arith.mulf %209, %208 : vector<2x32xf32>
    %cst_65 = arith.constant 1.000000e+00 : f32
    %211 = vector.broadcast %cst_65 : f32 to vector<2x1xf32>
    %212 = arith.subf %211, %181 : vector<2x1xf32>
    %213 = vector.broadcast %212 : vector<2x1xf32> to vector<2x32xf32>
    %214 = arith.mulf %213, %160 : vector<2x32xf32>
    %215 = arith.addf %210, %214 : vector<2x32xf32>
    %216 = vector.broadcast %181 : vector<2x1xf32> to vector<2x32xf32>
    %217 = arith.mulf %216, %206 : vector<2x32xf32>
    %cst_66 = arith.constant 1.000000e+00 : f32
    %218 = vector.broadcast %cst_66 : f32 to vector<2x1xf32>
    %219 = arith.subf %218, %181 : vector<2x1xf32>
    %220 = vector.broadcast %219 : vector<2x1xf32> to vector<2x32xf32>
    %221 = arith.mulf %220, %167 : vector<2x32xf32>
    %222 = arith.addf %217, %221 : vector<2x32xf32>
    %c0_67 = arith.constant 0 : index
    %223 = arith.index_cast %175 : i32 to index
    %c0_68 = arith.constant 0 : index
    %c0_69 = arith.constant 0 : index
    %224 = vector.load %arg7[%c0_67, %223, %c0_68, %c0_69] : memref<1x8x2x32xf32, #tpu.memory_space<vmem>>, vector<1x1x2x32xf32>
    %225 = vector.shape_cast %224 : vector<1x1x2x32xf32> to vector<2x32xf32>
    %226 = vector.shape_cast %215 : vector<2x32xf32> to vector<1x1x2x32xf32>
    tpu.vector_store %arg7[%c0_67, %223, %c0_68, %c0_69], %226 {strides = array<i32>} : memref<1x8x2x32xf32, #tpu.memory_space<vmem>>, vector<1x1x2x32xf32>,
    %c4_i32 = arith.constant 4 : i32
    %c2_i32_70 = arith.constant 2 : i32
    %227 = arith.muli %c2_i32_70, %c4_i32 : i32
    %c7_i32_71 = arith.constant 7 : i32
    %228 = arith.subi %c7_i32_71, %227 : i32
    %229 = arith.muli %arg0, %228 : i32
    %230 = arith.addi %c4_i32, %229 : i32
    %c0_72 = arith.constant 0 : index
    %231 = arith.index_cast %230 : i32 to index
    %c0_73 = arith.constant 0 : index
    %c0_74 = arith.constant 0 : index
    %232 = vector.load %arg2[%c0_72, %231, %c0_73, %c0_74] : memref<1x8x2x128xf32, #tpu.memory_space<vmem>>, vector<1x1x2x128xf32>
    %233 = vector.shape_cast %232 : vector<1x1x2x128xf32> to vector<2x128xf32>
    %234 = arith.index_cast %230 : i32 to index
    %c0_75 = arith.constant 0 : index
    %c0_76 = arith.constant 0 : index
    %235 = vector.load %arg3[%234, %c0_75, %c0_76] : memref<8x2x1xf32, #tpu.memory_space<vmem>>, vector<1x2x1xf32>
    %236 = vector.shape_cast %235 : vector<1x2x1xf32> to vector<2x1xf32>
    %cst_77 = arith.constant dense<0.000000e+00> : vector<2x128xf32>
    %237 = tpu.matmul %215, %4, %cst_77 {dimension_numbers = #tpu.dot_dimension_numbers<[1], [0], [0], [1], [0, 0, 1, 1], [], []>} : vector<2x32xf32>, vector<32x128xf32>, vector<2x128xf32> -> vector<2x128xf32>
    %238 = arith.addf %233, %237 : vector<2x128xf32>
    %239 = vector.extract_strided_slice %238 {offsets = [0, 0], sizes = [2, 32], strides = [1, 1]} : vector<2x128xf32> to vector<2x32xf32>
    %240 = arith.negf %239 : vector<2x32xf32>
    %241 = math.exp %240 : vector<2x32xf32>
    %cst_78 = arith.constant 1.000000e+00 : f32
    %242 = vector.broadcast %cst_78 : f32 to vector<2x32xf32>
    %243 = arith.addf %242, %241 : vector<2x32xf32>
    %244 = arith.divf %242, %243 : vector<2x32xf32>
    %245 = vector.extract_strided_slice %238 {offsets = [0, 32], sizes = [2, 32], strides = [1, 1]} : vector<2x128xf32> to vector<2x32xf32>
    %246 = arith.negf %245 : vector<2x32xf32>
    %247 = math.exp %246 : vector<2x32xf32>
    %cst_79 = arith.constant 1.000000e+00 : f32
    %248 = vector.broadcast %cst_79 : f32 to vector<2x32xf32>
    %249 = arith.addf %248, %247 : vector<2x32xf32>
    %250 = arith.divf %248, %249 : vector<2x32xf32>
    %251 = vector.extract_strided_slice %238 {offsets = [0, 64], sizes = [2, 32], strides = [1, 1]} : vector<2x128xf32> to vector<2x32xf32>
    %252 = math.tanh %251 : vector<2x32xf32>
    %253 = vector.extract_strided_slice %238 {offsets = [0, 96], sizes = [2, 32], strides = [1, 1]} : vector<2x128xf32> to vector<2x32xf32>
    %254 = arith.negf %253 : vector<2x32xf32>
    %255 = math.exp %254 : vector<2x32xf32>
    %cst_80 = arith.constant 1.000000e+00 : f32
    %256 = vector.broadcast %cst_80 : f32 to vector<2x32xf32>
    %257 = arith.addf %256, %255 : vector<2x32xf32>
    %258 = arith.divf %256, %257 : vector<2x32xf32>
    %259 = arith.mulf %250, %222 : vector<2x32xf32>
    %260 = arith.mulf %244, %252 : vector<2x32xf32>
    %261 = arith.addf %259, %260 : vector<2x32xf32>
    %262 = math.tanh %261 : vector<2x32xf32>
    %263 = arith.mulf %258, %262 : vector<2x32xf32>
    %264 = vector.broadcast %236 : vector<2x1xf32> to vector<2x32xf32>
    %265 = arith.mulf %264, %263 : vector<2x32xf32>
    %cst_81 = arith.constant 1.000000e+00 : f32
    %266 = vector.broadcast %cst_81 : f32 to vector<2x1xf32>
    %267 = arith.subf %266, %236 : vector<2x1xf32>
    %268 = vector.broadcast %267 : vector<2x1xf32> to vector<2x32xf32>
    %269 = arith.mulf %268, %215 : vector<2x32xf32>
    %270 = arith.addf %265, %269 : vector<2x32xf32>
    %271 = vector.broadcast %236 : vector<2x1xf32> to vector<2x32xf32>
    %272 = arith.mulf %271, %261 : vector<2x32xf32>
    %cst_82 = arith.constant 1.000000e+00 : f32
    %273 = vector.broadcast %cst_82 : f32 to vector<2x1xf32>
    %274 = arith.subf %273, %236 : vector<2x1xf32>
    %275 = vector.broadcast %274 : vector<2x1xf32> to vector<2x32xf32>
    %276 = arith.mulf %275, %222 : vector<2x32xf32>
    %277 = arith.addf %272, %276 : vector<2x32xf32>
    %c0_83 = arith.constant 0 : index
    %278 = arith.index_cast %230 : i32 to index
    %c0_84 = arith.constant 0 : index
    %c0_85 = arith.constant 0 : index
    %279 = vector.load %arg7[%c0_83, %278, %c0_84, %c0_85] : memref<1x8x2x32xf32, #tpu.memory_space<vmem>>, vector<1x1x2x32xf32>
    %280 = vector.shape_cast %279 : vector<1x1x2x32xf32> to vector<2x32xf32>
    %281 = vector.shape_cast %270 : vector<2x32xf32> to vector<1x1x2x32xf32>
    tpu.vector_store %arg7[%c0_83, %278, %c0_84, %c0_85], %281 {strides = array<i32>} : memref<1x8x2x32xf32, #tpu.memory_space<vmem>>, vector<1x1x2x32xf32>,
    %c5_i32 = arith.constant 5 : i32
    %c2_i32_86 = arith.constant 2 : i32
    %282 = arith.muli %c2_i32_86, %c5_i32 : i32
    %c7_i32_87 = arith.constant 7 : i32
    %283 = arith.subi %c7_i32_87, %282 : i32
    %284 = arith.muli %arg0, %283 : i32
    %285 = arith.addi %c5_i32, %284 : i32
    %c0_88 = arith.constant 0 : index
    %286 = arith.index_cast %285 : i32 to index
    %c0_89 = arith.constant 0 : index
    %c0_90 = arith.constant 0 : index
    %287 = vector.load %arg2[%c0_88, %286, %c0_89, %c0_90] : memref<1x8x2x128xf32, #tpu.memory_space<vmem>>, vector<1x1x2x128xf32>
    %288 = vector.shape_cast %287 : vector<1x1x2x128xf32> to vector<2x128xf32>
    %289 = arith.index_cast %285 : i32 to index
    %c0_91 = arith.constant 0 : index
    %c0_92 = arith.constant 0 : index
    %290 = vector.load %arg3[%289, %c0_91, %c0_92] : memref<8x2x1xf32, #tpu.memory_space<vmem>>, vector<1x2x1xf32>
    %291 = vector.shape_cast %290 : vector<1x2x1xf32> to vector<2x1xf32>
    %cst_93 = arith.constant dense<0.000000e+00> : vector<2x128xf32>
    %292 = tpu.matmul %270, %4, %cst_93 {dimension_numbers = #tpu.dot_dimension_numbers<[1], [0], [0], [1], [0, 0, 1, 1], [], []>} : vector<2x32xf32>, vector<32x128xf32>, vector<2x128xf32> -> vector<2x128xf32>
    %293 = arith.addf %288, %292 : vector<2x128xf32>
    %294 = vector.extract_strided_slice %293 {offsets = [0, 0], sizes = [2, 32], strides = [1, 1]} : vector<2x128xf32> to vector<2x32xf32>
    %295 = arith.negf %294 : vector<2x32xf32>
    %296 = math.exp %295 : vector<2x32xf32>
    %cst_94 = arith.constant 1.000000e+00 : f32
    %297 = vector.broadcast %cst_94 : f32 to vector<2x32xf32>
    %298 = arith.addf %297, %296 : vector<2x32xf32>
    %299 = arith.divf %297, %298 : vector<2x32xf32>
    %300 = vector.extract_strided_slice %293 {offsets = [0, 32], sizes = [2, 32], strides = [1, 1]} : vector<2x128xf32> to vector<2x32xf32>
    %301 = arith.negf %300 : vector<2x32xf32>
    %302 = math.exp %301 : vector<2x32xf32>
    %cst_95 = arith.constant 1.000000e+00 : f32
    %303 = vector.broadcast %cst_95 : f32 to vector<2x32xf32>
    %304 = arith.addf %303, %302 : vector<2x32xf32>
    %305 = arith.divf %303, %304 : vector<2x32xf32>
    %306 = vector.extract_strided_slice %293 {offsets = [0, 64], sizes = [2, 32], strides = [1, 1]} : vector<2x128xf32> to vector<2x32xf32>
    %307 = math.tanh %306 : vector<2x32xf32>
    %308 = vector.extract_strided_slice %293 {offsets = [0, 96], sizes = [2, 32], strides = [1, 1]} : vector<2x128xf32> to vector<2x32xf32>
    %309 = arith.negf %308 : vector<2x32xf32>
    %310 = math.exp %309 : vector<2x32xf32>
    %cst_96 = arith.constant 1.000000e+00 : f32
    %311 = vector.broadcast %cst_96 : f32 to vector<2x32xf32>
    %312 = arith.addf %311, %310 : vector<2x32xf32>
    %313 = arith.divf %311, %312 : vector<2x32xf32>
    %314 = arith.mulf %305, %277 : vector<2x32xf32>
    %315 = arith.mulf %299, %307 : vector<2x32xf32>
    %316 = arith.addf %314, %315 : vector<2x32xf32>
    %317 = math.tanh %316 : vector<2x32xf32>
    %318 = arith.mulf %313, %317 : vector<2x32xf32>
    %319 = vector.broadcast %291 : vector<2x1xf32> to vector<2x32xf32>
    %320 = arith.mulf %319, %318 : vector<2x32xf32>
    %cst_97 = arith.constant 1.000000e+00 : f32
    %321 = vector.broadcast %cst_97 : f32 to vector<2x1xf32>
    %322 = arith.subf %321, %291 : vector<2x1xf32>
    %323 = vector.broadcast %322 : vector<2x1xf32> to vector<2x32xf32>
    %324 = arith.mulf %323, %270 : vector<2x32xf32>
    %325 = arith.addf %320, %324 : vector<2x32xf32>
    %326 = vector.broadcast %291 : vector<2x1xf32> to vector<2x32xf32>
    %327 = arith.mulf %326, %316 : vector<2x32xf32>
    %cst_98 = arith.constant 1.000000e+00 : f32
    %328 = vector.broadcast %cst_98 : f32 to vector<2x1xf32>
    %329 = arith.subf %328, %291 : vector<2x1xf32>
    %330 = vector.broadcast %329 : vector<2x1xf32> to vector<2x32xf32>
    %331 = arith.mulf %330, %277 : vector<2x32xf32>
    %332 = arith.addf %327, %331 : vector<2x32xf32>
    %c0_99 = arith.constant 0 : index
    %333 = arith.index_cast %285 : i32 to index
    %c0_100 = arith.constant 0 : index
    %c0_101 = arith.constant 0 : index
    %334 = vector.load %arg7[%c0_99, %333, %c0_100, %c0_101] : memref<1x8x2x32xf32, #tpu.memory_space<vmem>>, vector<1x1x2x32xf32>
    %335 = vector.shape_cast %334 : vector<1x1x2x32xf32> to vector<2x32xf32>
    %336 = vector.shape_cast %325 : vector<2x32xf32> to vector<1x1x2x32xf32>
    tpu.vector_store %arg7[%c0_99, %333, %c0_100, %c0_101], %336 {strides = array<i32>} : memref<1x8x2x32xf32, #tpu.memory_space<vmem>>, vector<1x1x2x32xf32>,
    %c6_i32 = arith.constant 6 : i32
    %c2_i32_102 = arith.constant 2 : i32
    %337 = arith.muli %c2_i32_102, %c6_i32 : i32
    %c7_i32_103 = arith.constant 7 : i32
    %338 = arith.subi %c7_i32_103, %337 : i32
    %339 = arith.muli %arg0, %338 : i32
    %340 = arith.addi %c6_i32, %339 : i32
    %c0_104 = arith.constant 0 : index
    %341 = arith.index_cast %340 : i32 to index
    %c0_105 = arith.constant 0 : index
    %c0_106 = arith.constant 0 : index
    %342 = vector.load %arg2[%c0_104, %341, %c0_105, %c0_106] : memref<1x8x2x128xf32, #tpu.memory_space<vmem>>, vector<1x1x2x128xf32>
    %343 = vector.shape_cast %342 : vector<1x1x2x128xf32> to vector<2x128xf32>
    %344 = arith.index_cast %340 : i32 to index
    %c0_107 = arith.constant 0 : index
    %c0_108 = arith.constant 0 : index
    %345 = vector.load %arg3[%344, %c0_107, %c0_108] : memref<8x2x1xf32, #tpu.memory_space<vmem>>, vector<1x2x1xf32>
    %346 = vector.shape_cast %345 : vector<1x2x1xf32> to vector<2x1xf32>
    %cst_109 = arith.constant dense<0.000000e+00> : vector<2x128xf32>
    %347 = tpu.matmul %325, %4, %cst_109 {dimension_numbers = #tpu.dot_dimension_numbers<[1], [0], [0], [1], [0, 0, 1, 1], [], []>} : vector<2x32xf32>, vector<32x128xf32>, vector<2x128xf32> -> vector<2x128xf32>
    %348 = arith.addf %343, %347 : vector<2x128xf32>
    %349 = vector.extract_strided_slice %348 {offsets = [0, 0], sizes = [2, 32], strides = [1, 1]} : vector<2x128xf32> to vector<2x32xf32>
    %350 = arith.negf %349 : vector<2x32xf32>
    %351 = math.exp %350 : vector<2x32xf32>
    %cst_110 = arith.constant 1.000000e+00 : f32
    %352 = vector.broadcast %cst_110 : f32 to vector<2x32xf32>
    %353 = arith.addf %352, %351 : vector<2x32xf32>
    %354 = arith.divf %352, %353 : vector<2x32xf32>
    %355 = vector.extract_strided_slice %348 {offsets = [0, 32], sizes = [2, 32], strides = [1, 1]} : vector<2x128xf32> to vector<2x32xf32>
    %356 = arith.negf %355 : vector<2x32xf32>
    %357 = math.exp %356 : vector<2x32xf32>
    %cst_111 = arith.constant 1.000000e+00 : f32
    %358 = vector.broadcast %cst_111 : f32 to vector<2x32xf32>
    %359 = arith.addf %358, %357 : vector<2x32xf32>
    %360 = arith.divf %358, %359 : vector<2x32xf32>
    %361 = vector.extract_strided_slice %348 {offsets = [0, 64], sizes = [2, 32], strides = [1, 1]} : vector<2x128xf32> to vector<2x32xf32>
    %362 = math.tanh %361 : vector<2x32xf32>
    %363 = vector.extract_strided_slice %348 {offsets = [0, 96], sizes = [2, 32], strides = [1, 1]} : vector<2x128xf32> to vector<2x32xf32>
    %364 = arith.negf %363 : vector<2x32xf32>
    %365 = math.exp %364 : vector<2x32xf32>
    %cst_112 = arith.constant 1.000000e+00 : f32
    %366 = vector.broadcast %cst_112 : f32 to vector<2x32xf32>
    %367 = arith.addf %366, %365 : vector<2x32xf32>
    %368 = arith.divf %366, %367 : vector<2x32xf32>
    %369 = arith.mulf %360, %332 : vector<2x32xf32>
    %370 = arith.mulf %354, %362 : vector<2x32xf32>
    %371 = arith.addf %369, %370 : vector<2x32xf32>
    %372 = math.tanh %371 : vector<2x32xf32>
    %373 = arith.mulf %368, %372 : vector<2x32xf32>
    %374 = vector.broadcast %346 : vector<2x1xf32> to vector<2x32xf32>
    %375 = arith.mulf %374, %373 : vector<2x32xf32>
    %cst_113 = arith.constant 1.000000e+00 : f32
    %376 = vector.broadcast %cst_113 : f32 to vector<2x1xf32>
    %377 = arith.subf %376, %346 : vector<2x1xf32>
    %378 = vector.broadcast %377 : vector<2x1xf32> to vector<2x32xf32>
    %379 = arith.mulf %378, %325 : vector<2x32xf32>
    %380 = arith.addf %375, %379 : vector<2x32xf32>
    %381 = vector.broadcast %346 : vector<2x1xf32> to vector<2x32xf32>
    %382 = arith.mulf %381, %371 : vector<2x32xf32>
    %cst_114 = arith.constant 1.000000e+00 : f32
    %383 = vector.broadcast %cst_114 : f32 to vector<2x1xf32>
    %384 = arith.subf %383, %346 : vector<2x1xf32>
    %385 = vector.broadcast %384 : vector<2x1xf32> to vector<2x32xf32>
    %386 = arith.mulf %385, %332 : vector<2x32xf32>
    %387 = arith.addf %382, %386 : vector<2x32xf32>
    %c0_115 = arith.constant 0 : index
    %388 = arith.index_cast %340 : i32 to index
    %c0_116 = arith.constant 0 : index
    %c0_117 = arith.constant 0 : index
    %389 = vector.load %arg7[%c0_115, %388, %c0_116, %c0_117] : memref<1x8x2x32xf32, #tpu.memory_space<vmem>>, vector<1x1x2x32xf32>
    %390 = vector.shape_cast %389 : vector<1x1x2x32xf32> to vector<2x32xf32>
    %391 = vector.shape_cast %380 : vector<2x32xf32> to vector<1x1x2x32xf32>
    tpu.vector_store %arg7[%c0_115, %388, %c0_116, %c0_117], %391 {strides = array<i32>} : memref<1x8x2x32xf32, #tpu.memory_space<vmem>>, vector<1x1x2x32xf32>,
    %c7_i32_118 = arith.constant 7 : i32
    %c2_i32_119 = arith.constant 2 : i32
    %392 = arith.muli %c2_i32_119, %c7_i32_118 : i32
    %c7_i32_120 = arith.constant 7 : i32
    %393 = arith.subi %c7_i32_120, %392 : i32
    %394 = arith.muli %arg0, %393 : i32
    %395 = arith.addi %c7_i32_118, %394 : i32
    %c0_121 = arith.constant 0 : index
    %396 = arith.index_cast %395 : i32 to index
    %c0_122 = arith.constant 0 : index
    %c0_123 = arith.constant 0 : index
    %397 = vector.load %arg2[%c0_121, %396, %c0_122, %c0_123] : memref<1x8x2x128xf32, #tpu.memory_space<vmem>>, vector<1x1x2x128xf32>
    %398 = vector.shape_cast %397 : vector<1x1x2x128xf32> to vector<2x128xf32>
    %399 = arith.index_cast %395 : i32 to index
    %c0_124 = arith.constant 0 : index
    %c0_125 = arith.constant 0 : index
    %400 = vector.load %arg3[%399, %c0_124, %c0_125] : memref<8x2x1xf32, #tpu.memory_space<vmem>>, vector<1x2x1xf32>
    %401 = vector.shape_cast %400 : vector<1x2x1xf32> to vector<2x1xf32>
    %cst_126 = arith.constant dense<0.000000e+00> : vector<2x128xf32>
    %402 = tpu.matmul %380, %4, %cst_126 {dimension_numbers = #tpu.dot_dimension_numbers<[1], [0], [0], [1], [0, 0, 1, 1], [], []>} : vector<2x32xf32>, vector<32x128xf32>, vector<2x128xf32> -> vector<2x128xf32>
    %403 = arith.addf %398, %402 : vector<2x128xf32>
    %404 = vector.extract_strided_slice %403 {offsets = [0, 0], sizes = [2, 32], strides = [1, 1]} : vector<2x128xf32> to vector<2x32xf32>
    %405 = arith.negf %404 : vector<2x32xf32>
    %406 = math.exp %405 : vector<2x32xf32>
    %cst_127 = arith.constant 1.000000e+00 : f32
    %407 = vector.broadcast %cst_127 : f32 to vector<2x32xf32>
    %408 = arith.addf %407, %406 : vector<2x32xf32>
    %409 = arith.divf %407, %408 : vector<2x32xf32>
    %410 = vector.extract_strided_slice %403 {offsets = [0, 32], sizes = [2, 32], strides = [1, 1]} : vector<2x128xf32> to vector<2x32xf32>
    %411 = arith.negf %410 : vector<2x32xf32>
    %412 = math.exp %411 : vector<2x32xf32>
    %cst_128 = arith.constant 1.000000e+00 : f32
    %413 = vector.broadcast %cst_128 : f32 to vector<2x32xf32>
    %414 = arith.addf %413, %412 : vector<2x32xf32>
    %415 = arith.divf %413, %414 : vector<2x32xf32>
    %416 = vector.extract_strided_slice %403 {offsets = [0, 64], sizes = [2, 32], strides = [1, 1]} : vector<2x128xf32> to vector<2x32xf32>
    %417 = math.tanh %416 : vector<2x32xf32>
    %418 = vector.extract_strided_slice %403 {offsets = [0, 96], sizes = [2, 32], strides = [1, 1]} : vector<2x128xf32> to vector<2x32xf32>
    %419 = arith.negf %418 : vector<2x32xf32>
    %420 = math.exp %419 : vector<2x32xf32>
    %cst_129 = arith.constant 1.000000e+00 : f32
    %421 = vector.broadcast %cst_129 : f32 to vector<2x32xf32>
    %422 = arith.addf %421, %420 : vector<2x32xf32>
    %423 = arith.divf %421, %422 : vector<2x32xf32>
    %424 = arith.mulf %415, %387 : vector<2x32xf32>
    %425 = arith.mulf %409, %417 : vector<2x32xf32>
    %426 = arith.addf %424, %425 : vector<2x32xf32>
    %427 = math.tanh %426 : vector<2x32xf32>
    %428 = arith.mulf %423, %427 : vector<2x32xf32>
    %429 = vector.broadcast %401 : vector<2x1xf32> to vector<2x32xf32>
    %430 = arith.mulf %429, %428 : vector<2x32xf32>
    %cst_130 = arith.constant 1.000000e+00 : f32
    %431 = vector.broadcast %cst_130 : f32 to vector<2x1xf32>
    %432 = arith.subf %431, %401 : vector<2x1xf32>
    %433 = vector.broadcast %432 : vector<2x1xf32> to vector<2x32xf32>
    %434 = arith.mulf %433, %380 : vector<2x32xf32>
    %435 = arith.addf %430, %434 : vector<2x32xf32>
    %436 = vector.broadcast %401 : vector<2x1xf32> to vector<2x32xf32>
    %437 = arith.mulf %436, %426 : vector<2x32xf32>
    %cst_131 = arith.constant 1.000000e+00 : f32
    %438 = vector.broadcast %cst_131 : f32 to vector<2x1xf32>
    %439 = arith.subf %438, %401 : vector<2x1xf32>
    %440 = vector.broadcast %439 : vector<2x1xf32> to vector<2x32xf32>
    %441 = arith.mulf %440, %387 : vector<2x32xf32>
    %442 = arith.addf %437, %441 : vector<2x32xf32>
    %c0_132 = arith.constant 0 : index
    %443 = arith.index_cast %395 : i32 to index
    %c0_133 = arith.constant 0 : index
    %c0_134 = arith.constant 0 : index
    %444 = vector.load %arg7[%c0_132, %443, %c0_133, %c0_134] : memref<1x8x2x32xf32, #tpu.memory_space<vmem>>, vector<1x1x2x32xf32>
    %445 = vector.shape_cast %444 : vector<1x1x2x32xf32> to vector<2x32xf32>
    %446 = vector.shape_cast %435 : vector<2x32xf32> to vector<1x1x2x32xf32>
    tpu.vector_store %arg7[%c0_132, %443, %c0_133, %c0_134], %446 {strides = array<i32>} : memref<1x8x2x32xf32, #tpu.memory_space<vmem>>, vector<1x1x2x32xf32>,
    %c8_i32 = arith.constant 8 : i32
    %c0_135 = arith.constant 0 : index
    %c0_136 = arith.constant 0 : index
    %447 = vector.load %arg8[%c0_135, %c0_136] : memref<2x32xf32, #tpu.memory_space<vmem>>, vector<2x32xf32>
    tpu.vector_store %arg8[%c0_135, %c0_136], %435 {strides = array<i32>} : memref<2x32xf32, #tpu.memory_space<vmem>>, vector<2x32xf32>,
    %c0_137 = arith.constant 0 : index
    %c0_138 = arith.constant 0 : index
    %448 = vector.load %arg9[%c0_137, %c0_138] : memref<2x32xf32, #tpu.memory_space<vmem>>, vector<2x32xf32>
    tpu.vector_store %arg9[%c0_137, %c0_138], %442 {strides = array<i32>} : memref<2x32xf32, #tpu.memory_space<vmem>>, vector<2x32xf32>,
    return
  }
  func.func @transform_0(%arg0: i32, %arg1: i32) -> (i32, i32, i32, i32) {
    %c2_i32 = arith.constant 2 : i32
    %0 = arith.muli %c2_i32, %arg1 : i32
    %c0_i32 = arith.constant 0 : i32
    %1 = arith.subi %c0_i32, %0 : i32
    %2 = arith.muli %arg0, %1 : i32
    %3 = arith.addi %arg1, %2 : i32
    %c0_i32_0 = arith.constant 0 : i32
    %c0_i32_1 = arith.constant 0 : i32
    %c0_i32_2 = arith.constant 0 : i32
    return %arg0, %3, %c0_i32_0, %c0_i32_1 : i32, i32, i32, i32
  }
  func.func @transform_1(%arg0: i32, %arg1: i32) -> (i32, i32, i32) {
    %c2_i32 = arith.constant 2 : i32
    %0 = arith.muli %c2_i32, %arg1 : i32
    %c0_i32 = arith.constant 0 : i32
    %1 = arith.subi %c0_i32, %0 : i32
    %2 = arith.muli %arg0, %1 : i32
    %3 = arith.addi %arg1, %2 : i32
    %c0_i32_0 = arith.constant 0 : i32
    %c0_i32_1 = arith.constant 0 : i32
    %c0_i32_2 = arith.constant 0 : i32
    return %3, %c0_i32_0, %c0_i32_1 : i32, i32, i32
  }
  func.func @transform_2(%arg0: i32, %arg1: i32) -> (i32, i32, i32) {
    %c0_i32 = arith.constant 0 : i32
    %c0_i32_0 = arith.constant 0 : i32
    %c0_i32_1 = arith.constant 0 : i32
    return %arg0, %c0_i32, %c0_i32_0 : i32, i32, i32
  }
  func.func @transform_3(%arg0: i32, %arg1: i32) -> (i32, i32, i32) {
    %c0_i32 = arith.constant 0 : i32
    %c0_i32_0 = arith.constant 0 : i32
    %c0_i32_1 = arith.constant 0 : i32
    return %arg0, %c0_i32, %c0_i32_0 : i32, i32, i32
  }
  func.func @transform_4(%arg0: i32, %arg1: i32) -> (i32, i32, i32) {
    %c0_i32 = arith.constant 0 : i32
    %c0_i32_0 = arith.constant 0 : i32
    %c0_i32_1 = arith.constant 0 : i32
    return %arg0, %c0_i32, %c0_i32_0 : i32, i32, i32
  }
  func.func @transform_5(%arg0: i32, %arg1: i32) -> (i32, i32, i32, i32) {
    %c2_i32 = arith.constant 2 : i32
    %0 = arith.muli %c2_i32, %arg1 : i32
    %c0_i32 = arith.constant 0 : i32
    %1 = arith.subi %c0_i32, %0 : i32
    %2 = arith.muli %arg0, %1 : i32
    %3 = arith.addi %arg1, %2 : i32
    %c0_i32_0 = arith.constant 0 : i32
    %c0_i32_1 = arith.constant 0 : i32
    %c0_i32_2 = arith.constant 0 : i32
    return %arg0, %3, %c0_i32_0, %c0_i32_1 : i32, i32, i32, i32
  }
}

module attributes {stable_mosaic.version = 11 : i64} {
  func.func @_highway_kernel(%arg0: i32, %arg1: memref<16x32xf32, #tpu.memory_space<vmem>>, %arg2: memref<16x32xf32, #tpu.memory_space<vmem>>, %arg3: memref<16x64xf32, #tpu.memory_space<vmem>>, %arg4: memref<64x64xf32, #tpu.memory_space<vmem>>, %arg5: memref<1x64xf32, #tpu.memory_space<vmem>>, %arg6: memref<16x64xf32, #tpu.memory_space<vmem>>) attributes {dimension_semantics = [#tpu.dimension_semantics<parallel>], iteration_bounds = array<i64: 1>, scalar_prefetch = 0 : i64, scratch_operands = 0 : i64, tpu.core_type = #tpu.core_type<tc>, window_params = [{transform_indices = @transform_0, window_bounds = array<i64: 16, 32>}, {transform_indices = @transform_1, window_bounds = array<i64: 16, 32>}, {transform_indices = @transform_2, window_bounds = array<i64: 16, 64>}, {pipeline_mode = #tpu.pipeline_mode<synchronous>, transform_indices = @transform_3, window_bounds = array<i64: 64, 64>}, {pipeline_mode = #tpu.pipeline_mode<synchronous>, transform_indices = @transform_4, window_bounds = array<i64: 1, 64>}, {transform_indices = @transform_5, window_bounds = array<i64: 16, 64>}]} {
    %c0 = arith.constant 0 : index
    %c0_0 = arith.constant 0 : index
    %0 = vector.load %arg1[%c0, %c0_0] : memref<16x32xf32, #tpu.memory_space<vmem>>, vector<16x32xf32>
    %c0_1 = arith.constant 0 : index
    %c0_2 = arith.constant 0 : index
    %1 = vector.load %arg2[%c0_1, %c0_2] : memref<16x32xf32, #tpu.memory_space<vmem>>, vector<16x32xf32>
    %2 = tpu.concatenate %0, %1 in 1 : vector<16x32xf32>, vector<16x32xf32> -> vector<16x64xf32>
    %c0_3 = arith.constant 0 : index
    %c0_4 = arith.constant 0 : index
    %3 = vector.load %arg3[%c0_3, %c0_4] : memref<16x64xf32, #tpu.memory_space<vmem>>, vector<16x64xf32>
    %c0_5 = arith.constant 0 : index
    %c0_6 = arith.constant 0 : index
    %4 = vector.load %arg4[%c0_5, %c0_6] : memref<64x64xf32, #tpu.memory_space<vmem>>, vector<64x64xf32>
    %cst = arith.constant dense<0.000000e+00> : vector<16x64xf32>
    %5 = tpu.matmul %2, %4, %cst {dimension_numbers = #tpu.dot_dimension_numbers<[1], [0], [0], [1], [0, 0, 1, 1], [], []>} : vector<16x64xf32>, vector<64x64xf32>, vector<16x64xf32> -> vector<16x64xf32>
    %c0_7 = arith.constant 0 : index
    %c0_8 = arith.constant 0 : index
    %6 = vector.load %arg5[%c0_7, %c0_8] : memref<1x64xf32, #tpu.memory_space<vmem>>, vector<1x64xf32>
    %7 = vector.broadcast %6 : vector<1x64xf32> to vector<16x64xf32>
    %8 = arith.addf %5, %7 : vector<16x64xf32>
    %9 = arith.negf %8 : vector<16x64xf32>
    %10 = math.exp %9 : vector<16x64xf32>
    %cst_9 = arith.constant 1.000000e+00 : f32
    %11 = vector.broadcast %cst_9 : f32 to vector<16x64xf32>
    %12 = arith.addf %11, %10 : vector<16x64xf32>
    %13 = arith.divf %11, %12 : vector<16x64xf32>
    %14 = arith.mulf %13, %2 : vector<16x64xf32>
    %cst_10 = arith.constant 1.000000e+00 : f32
    %15 = vector.broadcast %cst_10 : f32 to vector<16x64xf32>
    %16 = arith.subf %15, %13 : vector<16x64xf32>
    %17 = arith.mulf %16, %3 : vector<16x64xf32>
    %18 = arith.addf %14, %17 : vector<16x64xf32>
    %c0_11 = arith.constant 0 : index
    %c0_12 = arith.constant 0 : index
    %19 = vector.load %arg6[%c0_11, %c0_12] : memref<16x64xf32, #tpu.memory_space<vmem>>, vector<16x64xf32>
    tpu.vector_store %arg6[%c0_11, %c0_12], %18 {strides = array<i32>} : memref<16x64xf32, #tpu.memory_space<vmem>>, vector<16x64xf32>,
    return
  }
  func.func @transform_0(%arg0: i32) -> (i32, i32) {
    %c0_i32 = arith.constant 0 : i32
    %c0_i32_0 = arith.constant 0 : i32
    return %arg0, %c0_i32 : i32, i32
  }
  func.func @transform_1(%arg0: i32) -> (i32, i32) {
    %c0_i32 = arith.constant 0 : i32
    %c0_i32_0 = arith.constant 0 : i32
    return %arg0, %c0_i32 : i32, i32
  }
  func.func @transform_2(%arg0: i32) -> (i32, i32) {
    %c0_i32 = arith.constant 0 : i32
    %c0_i32_0 = arith.constant 0 : i32
    return %arg0, %c0_i32 : i32, i32
  }
  func.func @transform_3(%arg0: i32) -> (i32, i32) {
    %c0_i32 = arith.constant 0 : i32
    %c0_i32_0 = arith.constant 0 : i32
    %c0_i32_1 = arith.constant 0 : i32
    return %c0_i32, %c0_i32_0 : i32, i32
  }
  func.func @transform_4(%arg0: i32) -> (i32, i32) {
    %c0_i32 = arith.constant 0 : i32
    %c0_i32_0 = arith.constant 0 : i32
    %c0_i32_1 = arith.constant 0 : i32
    return %c0_i32, %c0_i32_0 : i32, i32
  }
  func.func @transform_5(%arg0: i32) -> (i32, i32) {
    %c0_i32 = arith.constant 0 : i32
    %c0_i32_0 = arith.constant 0 : i32
    return %arg0, %c0_i32 : i32, i32
  }
}

</mosaic_0001>

<bundles_post_ra>
// kernel: highway_concat_bilstm_forward.5
= control target key start
LH: loop header
LB: loop body
LE: loop exit
PB: predicated region body
PF: predicated region fallthrough
CT: control target
= control target key end

     0   :  { %s219_s22 = smov 32   ;;  %vm32_vm0 = vcmask 261120   ;;  %vm52_vm1 = vcmask 523264   ;;  %s305_s1 = inlined_call_operand.vmem [shape: f32[16,32], index: 1, kind: input, shape index: {}]   ;;  %s306_s3 = inlined_call_operand.vmem [shape: f32[64,64], index: 3, kind: input, shape index: {}]   ;;  %s307_s0 = inlined_call_operand.vmem [shape: f32[16,32], index: 0, kind: input, shape index: {}]   ;;  %s308_s4 = inlined_call_operand.vmem [shape: f32[1,64], index: 4, kind: input, shape index: {}]   ;;  %s309_s2 = inlined_call_operand.vmem [shape: f32[16,64], index: 2, kind: input, shape index: {}]   ;;  %s310_s5 = inlined_call_operand.vmem [shape: f32[16,64], index: 5, kind: output, shape index: {}]  }
   0x1   :  { %v22_v0 = vld [vmem:[%s305_s1] sm:$0xff]  ;;  %v38_v2 = vld [vmem:[%s306_s3 + $0x8] sm:$0xff]  ;;  %v39_v3 = vld [vmem:[%s306_s3 + $0x10] sm:$0xff] }
   0x2   :  { %v37_v1 = vld [vmem:[%s306_s3] sm:$0xff]  ;;  %26 = vrot.lane.b32.xlu0 %v22_v0, %s219_s22  ;;  %v40_v4 = vld [vmem:[%s306_s3 + $0x18] sm:$0xff]  ;;  %v23_v5 = vld [vmem:[%s305_s1 + $0x8] sm:$0xff] }
   0x3   :  { %v194_v6 = vpack.c.bf16 %v38_v2, %v37_v1  ;;  %v198_v7 = vpack.c.bf16 %v40_v4, %v39_v3  ;;  %v41_v8 = vld [vmem:[%s306_s3 + $0x20] sm:$0xff]  ;;  %v42_v9 = vld [vmem:[%s306_s3 + $0x28] sm:$0xff]  ;;  %v43_v11 = vld [vmem:[%s306_s3 + $0x30] sm:$0xff] }
   0x4   :  { %v202_v10 = vpack.c.bf16 %v42_v9, %v41_v8  ;;  %v44_v12 = vld [vmem:[%s306_s3 + $0x38] sm:$0xff]  ;;  %v20_v14 = vld [vmem:[%s307_s0] sm:$0xff]  ;;  %v21_v17 = vld [vmem:[%s307_s0 + $0x8] sm:$0xff] }
   0x5   :  { %195 = vmatprep.subr.bf16.mxu0 %v194_v6  ;;  %v206_v13 = vpack.c.bf16 %v44_v12, %v43_v11  ;;  %v160_v20 = vld [vmem:[%s308_s4] ss:$0 sm:$0xff]  ;;  %v36_v32 = vld [vmem:[%s309_s2 + $0x8] sm:$0xff] }
   0x6   :  { %28 = vrot.lane.b32.xlu0 %v23_v5, %s219_s22  ;;  %197 = vmatpush3.bf16.msra.mxu0 %v194_v6  ;;  %v35_v35 = vld [vmem:[%s309_s2] sm:$0xff] }
   0x7   :  { %199 = vmatprep.subr.bf16.mxu0 %v198_v7 }
   0xa   :  { %201 = vmatpush3.bf16.msra.mxu0 %v198_v7 }
   0xb   :  { %203 = vmatprep.subr.bf16.mxu0 %v202_v10 }
   0xe   :  { %205 = vmatpush3.bf16.msra.mxu0 %v202_v10 }
   0xf   :  { %207 = vmatprep.subr.bf16.mxu0 %v206_v13 }
  0x12   :  { %209 = vmatpush3.bf16.msra.mxu0 %v206_v13 }
  0x74   :  { %v27_v15 = vpop.permute.xlu0 %26 }
  0x75   :  { %v33_v16 = vsel %vm32_vm0, %v20_v14, %v27_v15 }
  0x76   :  { %191 = vmatprep.mubr.msk.f32.mxu0 %vm52_vm1, %v33_v16 }
  0x78   :  { %v29_v18 = vpop.permute.xlu0 %28 }
  0x79   :  { %v34_v19 = vsel %vm32_vm0, %v21_v17, %v29_v18 }
  0x7a   :  { %192 = vmatmul.mubr.msk.f32.vlgmr.msra.gmra.mrb[0].mxu0 %vm52_vm1, %v34_v19 }
 0x14d   :  { %v193_v21 = vpop.f32.mrb[0].mxu0 }
 0x14e   :  { %v131_v22 = vadd.f32 %v193_v21, %v160_v20  ;;  %v125_v23 = vpop.f32.mrb[1].mxu0 }
 0x14f   :  { %v126_v24 = vadd.f32 %v160_v20, %v125_v23 }
 0x150   :  { %v164_v25 = vmul.f32 -1.442695, %v131_v22 }
 0x151   :  { %v163_v26 = vmul.f32 -1.442695, %v126_v24 }
 0x152   :  { %211 = vpow2.f32 %v164_v25 }
 0x153   :  { %213 = vpow2.f32 %v163_v26 }
 0x15c   :  { %v212_v27 = vpop.eup %211 }
 0x15d   :  { %v214_v28 = vpop.eup %213  ;;  %v141_v29 = vadd.f32 1.0, %v212_v27 }
 0x15e   :  { %v140_v30 = vadd.f32 1.0, %v214_v28 }
 0x15f   :  { %215 = vrcp.f32 %v141_v29 }
 0x160   :  { %217 = vrcp.f32 %v140_v30 }
 0x169   :  { %v216_v31 = vpop.eup %215 }
 0x16a   :  { %v218_v33 = vpop.eup %217  ;;  %v149_v34 = vsub.f32 1.0, %v216_v31  ;;  %v147_v37 = vmul.f32 %v216_v31, %v34_v19 }
 0x16b   :  { %v148_v36 = vsub.f32 1.0, %v218_v33  ;;  %v146_v39 = vmul.f32 %v218_v33, %v33_v16 }
 0x16c   :  { %v151_v38 = vmul.f32 %v149_v34, %v36_v32 }
 0x16d   :  { %v150_v40 = vmul.f32 %v148_v36, %v35_v35 }
 0x16e   :  { %v153_v41 = vadd.f32 %v151_v38, %v147_v37 }
 0x16f   :  { %v152_v42 = vadd.f32 %v150_v40, %v146_v39 }
 0x170   :  { %155 = vst.msk [vmem:[%s310_s5 + $0x8] sm:$0xff] %vm52_vm1, %v153_v41 }
 0x171   :  { %154 = vst.msk [vmem:[%s310_s5] sm:$0xff] %vm52_vm1, %v152_v42 }

// kernel: highway_concat_bilstm_forward.3
= control target key start
LH: loop header
LB: loop body
LE: loop exit
PB: predicated region body
PF: predicated region fallthrough
CT: control target
= control target key end

     0   :  { %s2100_s18 = smov 0   ;;  %s2102_s19 = smov 0   ;;  %s2355_s0 = inlined_call_operand.vmem [shape: f32[2,8,2,128], index: 0, kind: input, shape index: {}]   ;;  %s2356_s1 = inlined_call_operand.vmem [shape: f32[8,2,1], index: 1, kind: input, shape index: {}]   ;;  %s2357_s2 = inlined_call_operand.vmem [shape: f32[2,32,128], index: 2, kind: input, shape index: {}]   ;;  %s2358_s3 = inlined_call_operand.vmem [shape: f32[2,2,32], index: 3, kind: input, shape index: {}]   ;;  %s2359_s4 = inlined_call_operand.vmem [shape: f32[2,2,32], index: 4, kind: input, shape index: {}]   ;;  %s2360_s5 = inlined_call_operand.vmem [shape: f32[2,8,2,32], index: 5, kind: output, shape index: {}]  }
   0x1   :  { %s2104_s20 = smov 0  }
   0x2 LB: > { %s27_s21 = sadd.s32 1, %s2057_s19  ;;  %p1698_p0 = scmp.ge.s32.totalorder %s2061_s20, 1  ;;  %s2061_s20 = sphi %s2104_s20, %s15_s20   ;;  %s2057_s19 = sphi %s2102_s19, %s2362_s19   ;;  %s2053_s18 = sphi %s2100_s18, %s2361_s18  }
   0x3   : > { %p29_p1 = scmp.ge.s32.totalorder %s27_s21, 2  ;;  %p287_p2 = scmp.lt.s32.totalorder %s2061_s20, 3 }
   0x5   : > { %s2364_s21 = smov (%p29_p1, %s27_s21), 0  ;;  %p288_p3 = pnand %p1698_p0, %p287_p2 }
   0x6   : > { %p358_p4 = scmp.lt.s32.totalorder (!%p288_p3), %s2053_s18, 1  ;;  %v2063_v0 = vmov (!%p288_p3), 0.0|0.0   ;;  %vm2064_vm0 = vmmov (!%p288_p3), 0   ;;  %v2065_v1 = vmov (!%p288_p3), 0.0   ;;  %vm421_vm1 = vcmask (!%p288_p3), 254976   ;;  %s2164_s10 = smul.u32 (!%p288_p3), 14, %s2053_s18 }
   0x7   : > { %291 = sbr.rel (%p288_p3) target bundleno = 5679 (0x162f), region = 40  ;;  %1894 = vmatprep.subr.bf16.mxu0 (!%p288_p3), %v2063_v0  ;;  %1814 = vmatprep.mubr.msk.f32.mxu0 (!%p288_p3), %vm2064_vm0, %v2065_v1  ;;  %vm437_vm2 = vcmask (!%p288_p3), 261120   ;;  %v2066_v11 = vmov (!%p288_p3), 0   ;;  %s2067_s15 = smov (!%p288_p3), 64  }
   0x8   : > { %1900 = vmatprep.subr.bf16.mxu1 (!%p288_p3), %v2063_v0  ;;  %1825 = vmatprep.mubr.msk.f32.mxu1 (!%p288_p3), %vm2064_vm0, %v2065_v1  ;;  %s2069_s25 = smov (!%p288_p3), 96   ;;  %s2185_s26 = smul.u32 (!%p288_p3), 10, %s2053_s18 }
   0x9   : > { %1974 = vset.pattern.permute.xlu0 (!%p288_p3), %v2066_v11  ;;  %1973 = vset.pattern.permute.xlu1 (!%p288_p3), %v2066_v11  ;;  %s952_s6 = ssub.s32 (!%p288_p3), 4, %s2053_s18  ;;  %s2311_s28 = smul.u32 (!%p288_p3), 4294967286, %s2053_s18 }
   0xa   : > { %s1563_s29 = scalar_lea.vmem (!%p288_p3), %s2356_s1, %s2185_s26 }
   0xb   : > { %v1713_v40 = vld [vmem:[%s1563_s29 + $0x2] sm:$0x3] (!%p288_p3) }
   0xc   : > { %v682_v53 = vsub.f32 (!%p288_p3), 1.0, %v1713_v40 }
   0xe   : > { %s2125_s22 = scalar_select %p358_p4, %s2053_s18, 1 }
  0x10   : > { %s1764_s23 = sshll.u32 %s2125_s22, 5  ;;  %s1703_s24 = sshll.u32 %s2125_s22, 1 }
  0x11   : > { %s389_s27 = scalar_lea.vmem %s2357_s2, %s1764_s23  ;;  %s393_s30 = scalar_lea.vmem %s2358_s3, %s1703_s24 }
  0x12   : > { %v425_v2 = vld [vmem:[%s389_s27] sm:$0xff]  ;;  %v426_v3 = vld [vmem:[%s389_s27 + $0x8] sm:$0xff]  ;;  %v427_v4 = vld [vmem:[%s389_s27 + $0x10] sm:$0xff]  ;;  %s397_s8 = scalar_lea.vmem %s2359_s4, %s1703_s24  ;;  %s1763_s9 = sshll.u32 %s2125_s22, 4 }
  0x13   : > { %v2138_v5 = vpack.c.bf16 %v426_v3, %v425_v2  ;;  %v428_v6 = vld [vmem:[%s389_s27 + $0x18] sm:$0xff]  ;;  %v420_v7 = vld [vmem:[%s393_s30] sm:$0x3]  ;;  %s2171_s13 = scalar_lea.vmem %s2355_s0, %s1763_s9  ;;  %s435_s23 = scalar_lea.vmem %s2356_s1, %s2164_s10 }
  0x14   : > { %422 = vst.msk [vmem:[#allocation2] sm:$0x3] %vm421_vm1, %v420_v7  ;;  %v2142_v8 = vpack.c.bf16 %v428_v6, %v427_v4  ;;  %v423_v10 = vld [vmem:[%s397_s8] sm:$0x3]  ;;  %s433_s14 = scalar_lea.vmem %s2171_s13, %s2164_s10  ;;  %s2068_s24 = smov 32  }
  0x15   : > { %1896 = vmatpush3.bf16.msra.mxu0 %v2138_v5  ;;  %1902 = vmatpush3.bf16.msra.mxu1 %v2138_v5  ;;  %424 = vst.msk [vmem:[#allocation3] sm:$0x3] %vm421_vm1, %v423_v10  ;;  %v434_v12 = vld [vmem:[%s433_s14] sm:$0x3]  ;;  %s2198_s7 = scalar_lea.vmem %s2360_s5, %s1763_s9  ;;  %s1559_s22 = scalar_lea.vmem %s2171_s13, %s2185_s26 }
  0x16   : > { %1897 = vmatprep.subr.bf16.mxu0 %v2063_v0  ;;  %1903 = vmatprep.subr.bf16.mxu1 %v2063_v0  ;;  %v436_v18 = vld [vmem:[%s435_s23] sm:$0x3]  ;;  %s569_s8 = scalar_lea.vmem %s2198_s7, %s2164_s10  ;;  %v1711_v42 = vld [vmem:[%s1559_s22 + $0x2] sm:$0x3]  ;;  %s1567_s9 = scalar_lea.vmem %s2198_s7, %s2185_s26 }
  0x17   : > { %v546_v25 = vsub.f32 1.0, %v436_v18  ;;  %s2227_s10 = smul.u32 6, %s2053_s18  ;;  %s2250_s23 = sshll.u32 %s2053_s18, 1 }
  0x18   : > { %s1582_s26 = scalar_lea.vmem %s2171_s13, %s2250_s23  ;;  %s1585_s29 = scalar_lea.vmem %s2356_s1, %s2250_s23 }
  0x19   : > { %1899 = vmatpush3.bf16.msra.mxu0 %v2142_v8  ;;  %1905 = vmatpush3.bf16.msra.mxu1 %v2142_v8  ;;  %s1571_s11 = scalar_lea.vmem %s2171_s13, %s2227_s10  ;;  %s1575_s16 = scalar_lea.vmem %s2356_s1, %s2227_s10 }
  0x1a   : > { %1906 = vmatprep.subr.bf16.mxu0 %v2063_v0  ;;  %1912 = vmatprep.subr.bf16.mxu1 %v2063_v0  ;;  %s1579_s17 = scalar_lea.vmem %s2198_s7, %s2227_s10  ;;  %s1588_s30 = scalar_lea.vmem %s2198_s7, %s2250_s23 }
  0x1b   : > { %v429_v9 = vld [vmem:[#allocation2] sm:$0x3]  ;;  %s2294_s14 = smul.u32 4294967290, %s2053_s18 }
  0x1c   : > { %1815 = vmatmul.mubr.msk.f32.vlgmr.msra.gmra.mrb[0].mxu0 %vm437_vm2, %v429_v9  ;;  %v430_v17 = vld [vmem:[#allocation3] sm:$0x3] }
  0x1d   : > { %1908 = vmatpush3.bf16.msra.mxu0 %v2138_v5  ;;  %1836 = vmatprep.mubr.msk.f32.mxu0 %vm2064_vm0, %v2065_v1  ;;  %s1606_s27 = scalar_lea.vmem %s2198_s7, %s2294_s14 }
  0x1e   : > { %1909 = vmatprep.subr.bf16.mxu0 %v2063_v0 }
  0x21   : > { %1911 = vmatpush3.bf16.msra.mxu0 %v2142_v8 }
  0x22   : > { %1918 = vmatprep.subr.bf16.mxu0 %v2063_v0 }
  0xef   : > { %v507_v13 = vpop.f32.mrb[0].mxu0 }
  0xf0   : > { %v511_v14 = vadd.f32 %v507_v13, %v434_v12  ;;  %v1816_v15 = vpop.f32.mrb[1].mxu0 }
  0xf2   : > { %1975 = vtanh.f32 %v511_v14  ;;  %v1709_v19 = vmul.f32 -1.442695, %v511_v14  ;;  %v1721_v14 = vld [vmem:[%s1575_s16 + $0x4] sm:$0x3]  ;;  %s1598_s16 = scalar_lea.vmem %s2171_s13, %s2294_s14 }
  0xf4   : > { %1977 = vpow2.f32 %v1709_v19 }
  0xfc   : > { %v1976_v16 = vpop.eup %1975 }
  0xfd   : > { %525 = vrot.lane.b32.xlu0 %v1976_v16, %s2067_s15 }
  0xfe   : > { %v1978_v20 = vpop.eup %1977 }
  0xff   : > { %v515_v21 = vadd.f32 1.0, %v1978_v20 }
 0x101   : > { %520 = vrot.lane.b32.xlu0 %v430_v17, %s2068_s24  ;;  %1979 = vrcp.f32 %v515_v21  ;;  %v809_v21 = vsub.f32 1.0, %v1721_v14 }
 0x105   : > { %542 = vperm.xlu0 %1974, %v436_v18  }
 0x10b   : > { %v1980_v22 = vpop.eup %1979 }
 0x16f   : > { %v526_v23 = vpop.permute.xlu0 %525 }
 0x170   : > { %v528_v24 = vmul.f32 %v1980_v22, %v526_v23 }
 0x172   : > { %530 = vrot.lane.b32.xlu1 %v528_v24, %s2068_s24 }
 0x173   : > { %v521_v26 = vpop.permute.xlu0 %520 }
 0x174   : > { %v523_v27 = vmul.f32 %v1980_v22, %v521_v26 }
 0x176   : > { %549 = vperm.xlu1 %1973, %v546_v25  }
 0x184   : > { %v543_v35 = vpop.permute.xlu0 %542 }
 0x1e4   : > { %v531_v28 = vpop.permute.xlu1 %530 }
 0x1e5   : > { %v533_v29 = vadd.f32 %v531_v28, %v523_v27 }
 0x1e7   : > { %1981 = vtanh.f32 %v533_v29  ;;  %v558_v55 = vmul.f32 %v543_v35, %v533_v29 }
 0x1f1   : > { %v1982_v30 = vpop.eup %1981 }
 0x1f2   : > { %536 = vrot.lane.b32.xlu1 %v1982_v30, %s2067_s15 }
 0x1f5   : > { %v550_v31 = vpop.permute.xlu1 %549 }
 0x1f6   : > { %v552_v32 = vmul.f32 %v550_v31, %v429_v9  ;;  %v559_v39 = vmul.f32 %v550_v31, %v430_v17  ;;  %v1719_v9 = vld [vmem:[%s1571_s11 + $0x4] sm:$0x3] }
 0x1f8   : > { %554 = vrot.lane.b32.xlu1 %v552_v32, %s2069_s25 }
 0x264   : > { %v537_v33 = vpop.permute.xlu1 %536 }
 0x265   : > { %v539_v34 = vmul.f32 %v1980_v22, %v537_v33 }
 0x267   : > { %v545_v36 = vmul.f32 %v543_v35, %v539_v34 }
 0x26a   : > { %v555_v37 = vpop.permute.xlu1 %554 }
 0x26b   : > { %v557_v38 = vadd.f32 %v555_v37, %v545_v36  ;;  %v1727_v37 = vld [vmem:[%s1582_s26 + $0x6] sm:$0x3]  ;;  %s1602_s26 = scalar_lea.vmem %s2356_s1, %s2294_s14 }
 0x26d   : > { %566 = vrot.lane.b32.xlu0 %v557_v38, %s2068_s24 }
 0x271   : > { %561 = vrot.lane.b32.xlu0 %v559_v39, %s2068_s24 }
 0x275   : > { %678 = vperm.xlu0 %1974, %v1713_v40  }
 0x2df   : > { %v567_v41 = vpop.permute.xlu0 %566 }
 0x2e0   : > { %571 = vst.msk [vmem:[%s569_s8] sm:$0x3] %vm421_vm1, %v567_v41  ;;  %1826 = vmatmul.mubr.msk.f32.vlgmr.msra.gmra.mrb[0].mxu1 %vm437_vm2, %v567_v41  ;;  %s2272_s8 = sshll.u32 %s952_s6, 1 }
 0x2e1   : > { %1914 = vmatpush3.bf16.msra.mxu1 %v2138_v5  ;;  %1847 = vmatprep.mubr.msk.f32.mxu1 %vm2064_vm0, %v2065_v1  ;;  %s954_s22 = scalar_lea.vmem %s2171_s13, %s2272_s8  ;;  %s956_s11 = scalar_lea.vmem %s2356_s1, %s2272_s8 }
 0x2e2   : > { %1915 = vmatprep.subr.bf16.mxu1 %v2063_v0  ;;  %s1076_s12 = scalar_lea.vmem %s2198_s7, %s2272_s8  ;;  %s1614_s8 = scalar_lea.vmem %s2356_s1, %s2311_s28 }
 0x2e3   : > { %v562_v54 = vpop.permute.xlu0 %561 }
 0x2e4   : > { %v564_v56 = vadd.f32 %v562_v54, %v558_v55 }
 0x2e5   : > { %1917 = vmatpush3.bf16.msra.mxu1 %v2142_v8 }
 0x2e6   : > { %1924 = vmatprep.subr.bf16.mxu1 %v2063_v0 }
 0x2f4   : > { %v679_v61 = vpop.permute.xlu0 %678 }
 0x3b3   : > { %v647_v43 = vpop.f32.mrb[0].mxu1 }
 0x3b4   : > { %v651_v44 = vadd.f32 %v1711_v42, %v647_v43  ;;  %v1827_v45 = vpop.f32.mrb[1].mxu1  ;;  %v1729_v42 = vld [vmem:[%s1585_s29 + $0x6] sm:$0x3]  ;;  %s1610_s29 = scalar_lea.vmem %s2171_s13, %s2311_s28 }
 0x3b6   : > { %1983 = vtanh.f32 %v651_v44  ;;  %v1715_v47 = vmul.f32 -1.442695, %v651_v44 }
 0x3b8   : > { %1985 = vpow2.f32 %v1715_v47 }
 0x3c0   : > { %v1984_v46 = vpop.eup %1983 }
 0x3c1   : > { %661 = vrot.lane.b32.xlu1 %v1984_v46, %s2067_s15 }
 0x3c2   : > { %v1986_v48 = vpop.eup %1985 }
 0x3c3   : > { %v655_v49 = vadd.f32 1.0, %v1986_v48 }
 0x3c5   : > { %1987 = vrcp.f32 %v655_v49  ;;  %v935_v49 = vsub.f32 1.0, %v1729_v42 }
 0x3cf   : > { %v1988_v50 = vpop.eup %1987 }
 0x3d0   : > { %v659_v57 = vmul.f32 %v1988_v50, %v564_v56 }
 0x433   : > { %v662_v51 = vpop.permute.xlu1 %661 }
 0x434   : > { %v664_v52 = vmul.f32 %v1988_v50, %v662_v51 }
 0x436   : > { %666 = vrot.lane.b32.xlu1 %v664_v52, %s2068_s24 }
 0x43a   : > { %685 = vperm.xlu1 %1973, %v682_v53  }
 0x4a8   : > { %v667_v58 = vpop.permute.xlu1 %666 }
 0x4a9   : > { %v669_v59 = vadd.f32 %v667_v58, %v659_v57 }
 0x4ab   : > { %1989 = vtanh.f32 %v669_v59  ;;  %v690_v23 = vmul.f32 %v679_v61, %v669_v59 }
 0x4b5   : > { %v1990_v60 = vpop.eup %1989 }
 0x4b6   : > { %672 = vrot.lane.b32.xlu0 %v1990_v60, %s2067_s15 }
 0x4b9   : > { %v686_v62 = vpop.permute.xlu1 %685 }
 0x4ba   : > { %v688_v3 = vmul.f32 %v686_v62, %v557_v38  ;;  %v691_v22 = vmul.f32 %v686_v62, %v564_v56 }
 0x4bc   : > { %v692_v24 = vadd.f32 %v691_v22, %v690_v23 }
 0x528   : > { %v673_v63 = vpop.permute.xlu0 %672 }
 0x529   : > { %v675_v2 = vmul.f32 %v1988_v50, %v673_v63 }
 0x52b   : > { %v681_v4 = vmul.f32 %v679_v61, %v675_v2 }
 0x52d   : > { %v689_v6 = vadd.f32 %v688_v3, %v681_v4  ;;  %v955_v3 = vld [vmem:[%s954_s22] sm:$0x3]  ;;  %s1618_s22 = scalar_lea.vmem %s2198_s7, %s2311_s28 }
 0x52f   : > { %694 = vrot.lane.b32.xlu1 %v689_v6, %s2068_s24 }
 0x5a1   : > { %v695_v7 = vpop.permute.xlu1 %694 }
 0x5a2   : > { %1717 = vst.msk [vmem:[%s1567_s9 + $0x2] sm:$0x3] %vm421_vm1, %v695_v7  ;;  %1837 = vmatmul.mubr.msk.f32.vlgmr.msra.gmra.mrb[2].mxu0 %vm437_vm2, %v695_v7  ;;  %s2328_s9 = smul.u32 4294967282, %s2053_s18 }
 0x5a3   : > { %1920 = vmatpush3.bf16.msra.mxu0 %v2138_v5  ;;  %1858 = vmatprep.mubr.msk.f32.mxu0 %vm2064_vm0, %v2065_v1 }
 0x5a4   : > { %1921 = vmatprep.subr.bf16.mxu0 %v2063_v0  ;;  %s1622_s10 = scalar_lea.vmem %s2171_s13, %s2328_s9  ;;  %s1626_s14 = scalar_lea.vmem %s2356_s1, %s2328_s9 }
 0x5a5   : > { %s1630_s18 = scalar_lea.vmem %s2198_s7, %s2328_s9 }
 0x5a7   : > { %1923 = vmatpush3.bf16.msra.mxu0 %v2142_v8 }
 0x5a8   : > { %1930 = vmatprep.subr.bf16.mxu0 %v2063_v0 }
 0x675   : > { %v774_v10 = vpop.f32.mrb[2].mxu0 }
 0x676   : > { %v778_v11 = vadd.f32 %v1719_v9, %v774_v10  ;;  %v1838_v12 = vpop.f32.mrb[3].mxu0  ;;  %v957_v10 = vld [vmem:[%s956_s11] sm:$0x3] }
 0x678   : > { %1991 = vtanh.f32 %v778_v11  ;;  %v1723_v15 = vmul.f32 -1.442695, %v778_v11 }
 0x67a   : > { %1993 = vpow2.f32 %v1723_v15 }
 0x682   : > { %v1992_v13 = vpop.eup %1991 }
 0x683   : > { %788 = vrot.lane.b32.xlu0 %v1992_v13, %s2067_s15 }
 0x684   : > { %v1994_v16 = vpop.eup %1993 }
 0x685   : > { %v782_v17 = vadd.f32 1.0, %v1994_v16 }
 0x687   : > { %805 = vperm.xlu0 %1974, %v1721_v14   ;;  %1995 = vrcp.f32 %v782_v17  ;;  %v1061_v17 = vsub.f32 1.0, %v957_v10 }
 0x691   : > { %v1996_v18 = vpop.eup %1995 }
 0x692   : > { %v786_v25 = vmul.f32 %v1996_v18, %v692_v24 }
 0x6f5   : > { %v789_v19 = vpop.permute.xlu0 %788 }
 0x6f6   : > { %v791_v20 = vmul.f32 %v1996_v18, %v789_v19 }
 0x6f8   : > { %793 = vrot.lane.b32.xlu1 %v791_v20, %s2068_s24 }
 0x6fc   : > { %812 = vperm.xlu1 %1973, %v809_v21  }
 0x706   : > { %v806_v29 = vpop.permute.xlu0 %805 }
 0x76a   : > { %v794_v26 = vpop.permute.xlu1 %793 }
 0x76b   : > { %v796_v27 = vadd.f32 %v794_v26, %v786_v25 }
 0x76d   : > { %1997 = vtanh.f32 %v796_v27  ;;  %v817_v51 = vmul.f32 %v806_v29, %v796_v27 }
 0x777   : > { %v1998_v28 = vpop.eup %1997 }
 0x778   : > { %799 = vrot.lane.b32.xlu0 %v1998_v28, %s2067_s15 }
 0x77b   : > { %v813_v30 = vpop.permute.xlu1 %812 }
 0x77c   : > { %v815_v33 = vmul.f32 %v813_v30, %v689_v6  ;;  %v818_v50 = vmul.f32 %v813_v30, %v692_v24 }
 0x77e   : > { %v819_v52 = vadd.f32 %v818_v50, %v817_v51 }
 0x7ea   : > { %v800_v31 = vpop.permute.xlu0 %799 }
 0x7eb   : > { %v802_v32 = vmul.f32 %v1996_v18, %v800_v31 }
 0x7ed   : > { %v808_v34 = vmul.f32 %v806_v29, %v802_v32 }
 0x7ef   : > { %v816_v35 = vadd.f32 %v815_v33, %v808_v34  ;;  %v1738_v33 = vld [vmem:[%s1598_s16 + $0xa] sm:$0x3] }
 0x7f1   : > { %821 = vrot.lane.b32.xlu1 %v816_v35, %s2068_s24 }
 0x863   : > { %v822_v36 = vpop.permute.xlu1 %821 }
 0x864   : > { %1725 = vst.msk [vmem:[%s1579_s17 + $0x4] sm:$0x3] %vm421_vm1, %v822_v36  ;;  %1848 = vmatmul.mubr.msk.f32.vlgmr.msra.gmra.mrb[2].mxu1 %vm437_vm2, %v822_v36 }
 0x865   : > { %1926 = vmatpush3.bf16.msra.mxu1 %v2138_v5  ;;  %1869 = vmatprep.mubr.msk.f32.mxu1 %vm2064_vm0, %v2065_v1 }
 0x866   : > { %1927 = vmatprep.subr.bf16.mxu1 %v2063_v0 }
 0x869   : > { %1929 = vmatpush3.bf16.msra.mxu1 %v2142_v8 }
 0x86a   : > { %1936 = vmatprep.subr.bf16.mxu1 %v2063_v0 }
 0x937   : > { %v900_v38 = vpop.f32.mrb[2].mxu1 }
 0x938   : > { %v904_v39 = vadd.f32 %v1727_v37, %v900_v38  ;;  %v1849_v40 = vpop.f32.mrb[3].mxu1 }
 0x93a   : > { %1999 = vtanh.f32 %v904_v39  ;;  %v1731_v43 = vmul.f32 -1.442695, %v904_v39 }
 0x93c   : > { %2001 = vpow2.f32 %v1731_v43 }
 0x944   : > { %v2000_v41 = vpop.eup %1999 }
 0x945   : > { %914 = vrot.lane.b32.xlu0 %v2000_v41, %s2067_s15 }
 0x946   : > { %v2002_v44 = vpop.eup %2001 }
 0x947   : > { %v908_v45 = vadd.f32 1.0, %v2002_v44 }
 0x949   : > { %931 = vperm.xlu0 %1974, %v1729_v42   ;;  %2003 = vrcp.f32 %v908_v45 }
 0x953   : > { %v2004_v46 = vpop.eup %2003 }
 0x954   : > { %v912_v53 = vmul.f32 %v2004_v46, %v819_v52 }
 0x9b7   : > { %v915_v47 = vpop.permute.xlu0 %914 }
 0x9b8   : > { %v917_v48 = vmul.f32 %v2004_v46, %v915_v47 }
 0x9ba   : > { %919 = vrot.lane.b32.xlu1 %v917_v48, %s2068_s24 }
 0x9be   : > { %938 = vperm.xlu1 %1973, %v935_v49  }
 0x9c8   : > { %v932_v57 = vpop.permute.xlu0 %931 }
 0xa2c   : > { %v920_v54 = vpop.permute.xlu1 %919 }
 0xa2d   : > { %v922_v55 = vadd.f32 %v920_v54, %v912_v53 }
 0xa2f   : > { %2005 = vtanh.f32 %v922_v55  ;;  %v943_v19 = vmul.f32 %v932_v57, %v922_v55 }
 0xa39   : > { %v2006_v56 = vpop.eup %2005 }
 0xa3a   : > { %925 = vrot.lane.b32.xlu0 %v2006_v56, %s2067_s15 }
 0xa3d   : > { %v939_v58 = vpop.permute.xlu1 %938 }
 0xa3e   : > { %v941_v61 = vmul.f32 %v939_v58, %v816_v35  ;;  %v944_v18 = vmul.f32 %v939_v58, %v819_v52 }
 0xa40   : > { %v945_v20 = vadd.f32 %v944_v18, %v943_v19 }
 0xaac   : > { %v926_v59 = vpop.permute.xlu0 %925 }
 0xaad   : > { %v928_v60 = vmul.f32 %v2004_v46, %v926_v59 }
 0xaaf   : > { %v934_v62 = vmul.f32 %v932_v57, %v928_v60  ;;  %v1746_v57 = vld [vmem:[%s1610_s29 + $0xc] sm:$0x3] }
 0xab1   : > { %v942_v63 = vadd.f32 %v941_v61, %v934_v62  ;;  %v1748_v62 = vld [vmem:[%s1614_s8 + $0xc] sm:$0x3] }
 0xab3   : > { %947 = vrot.lane.b32.xlu1 %v942_v63, %s2068_s24 }
 0xb25   : > { %v948_v2 = vpop.permute.xlu1 %947 }
 0xb26   : > { %1733 = vst.msk [vmem:[%s1588_s30 + $0x6] sm:$0x3] %vm421_vm1, %v948_v2  ;;  %1859 = vmatmul.mubr.msk.f32.vlgmr.msra.gmra.mrb[4].mxu0 %vm437_vm2, %v948_v2 }
 0xb27   : > { %1932 = vmatpush3.bf16.msra.mxu0 %v2138_v5  ;;  %1880 = vmatprep.mubr.msk.f32.mxu0 %vm2064_vm0, %v2065_v1 }
 0xb28   : > { %1933 = vmatprep.subr.bf16.mxu0 %v2063_v0 }
 0xb2b   : > { %1935 = vmatpush3.bf16.msra.mxu0 %v2142_v8 }
 0xbf9   : > { %v1026_v4 = vpop.f32.mrb[4].mxu0 }
 0xbfa   : > { %v1030_v6 = vadd.f32 %v1026_v4, %v955_v3  ;;  %v1860_v7 = vpop.f32.mrb[5].mxu0 }
 0xbfc   : > { %2007 = vtanh.f32 %v1030_v6  ;;  %v1736_v11 = vmul.f32 -1.442695, %v1030_v6 }
 0xbfe   : > { %2009 = vpow2.f32 %v1736_v11 }
 0xc06   : > { %v2008_v9 = vpop.eup %2007 }
 0xc07   : > { %1040 = vrot.lane.b32.xlu0 %v2008_v9, %s2067_s15  ;;  %v1315_v9 = vsub.f32 1.0, %v1748_v62 }
 0xc08   : > { %v2010_v12 = vpop.eup %2009 }
 0xc09   : > { %v1034_v13 = vadd.f32 1.0, %v2010_v12 }
 0xc0b   : > { %1057 = vperm.xlu0 %1974, %v957_v10   ;;  %2011 = vrcp.f32 %v1034_v13 }
 0xc15   : > { %v2012_v14 = vpop.eup %2011 }
 0xc16   : > { %v1038_v21 = vmul.f32 %v2012_v14, %v945_v20 }
 0xc79   : > { %v1041_v15 = vpop.permute.xlu0 %1040 }
 0xc7a   : > { %v1043_v16 = vmul.f32 %v2012_v14, %v1041_v15 }
 0xc7c   : > { %1045 = vrot.lane.b32.xlu1 %v1043_v16, %s2068_s24 }
 0xc80   : > { %1064 = vperm.xlu1 %1973, %v1061_v17  }
 0xc8a   : > { %v1058_v25 = vpop.permute.xlu0 %1057 }
 0xcee   : > { %v1046_v22 = vpop.permute.xlu1 %1045 }
 0xcef   : > { %v1048_v23 = vadd.f32 %v1046_v22, %v1038_v21 }
 0xcf1   : > { %2013 = vtanh.f32 %v1048_v23  ;;  %v1069_v43 = vmul.f32 %v1058_v25, %v1048_v23 }
 0xcfb   : > { %v2014_v24 = vpop.eup %2013 }
 0xcfc   : > { %1051 = vrot.lane.b32.xlu0 %v2014_v24, %s2067_s15 }
 0xcff   : > { %v1065_v26 = vpop.permute.xlu1 %1064 }
 0xd00   : > { %v1067_v29 = vmul.f32 %v1065_v26, %v942_v63  ;;  %v1070_v42 = vmul.f32 %v1065_v26, %v945_v20 }
 0xd02   : > { %v1071_v44 = vadd.f32 %v1070_v42, %v1069_v43 }
 0xd6e   : > { %v1052_v27 = vpop.permute.xlu0 %1051 }
 0xd6f   : > { %v1054_v28 = vmul.f32 %v2012_v14, %v1052_v27 }
 0xd71   : > { %v1060_v30 = vmul.f32 %v1058_v25, %v1054_v28  ;;  %v1754_v25 = vld [vmem:[%s1622_s10 + $0xe] sm:$0x3] }
 0xd73   : > { %v1068_v31 = vadd.f32 %v1067_v29, %v1060_v30  ;;  %v1756_v30 = vld [vmem:[%s1626_s14 + $0xe] sm:$0x3] }
 0xd75   : > { %1073 = vrot.lane.b32.xlu1 %v1068_v31, %s2068_s24 }
 0xde7   : > { %v1074_v32 = vpop.permute.xlu1 %1073 }
 0xde8   : > { %1077 = vst.msk [vmem:[%s1076_s12] sm:$0x3] %vm421_vm1, %v1074_v32  ;;  %1870 = vmatmul.mubr.msk.f32.vlgmr.msra.gmra.mrb[4].mxu1 %vm437_vm2, %v1074_v32 }
 0xde9   : > { %1938 = vmatpush3.bf16.msra.mxu1 %v2138_v5  ;;  %1891 = vmatprep.mubr.msk.f32.mxu1 %vm2064_vm0, %v2065_v1 }
 0xdea   : > { %1939 = vmatprep.subr.bf16.mxu1 %v2063_v0  ;;  %v1740_v0 = vld [vmem:[%s1602_s26 + $0xa] sm:$0x3] }
 0xdeb   : > { %v1188_v41 = vsub.f32 1.0, %v1740_v0 }
 0xded   : > { %1941 = vmatpush3.bf16.msra.mxu1 %v2142_v8 }
 0xebb   : > { %v1153_v34 = vpop.f32.mrb[4].mxu1 }
 0xebc   : > { %v1157_v35 = vadd.f32 %v1738_v33, %v1153_v34  ;;  %v1871_v36 = vpop.f32.mrb[5].mxu1 }
 0xebe   : > { %2015 = vtanh.f32 %v1157_v35  ;;  %v1742_v1 = vmul.f32 -1.442695, %v1157_v35 }
 0xec0   : > { %2017 = vpow2.f32 %v1742_v1 }
 0xec8   : > { %v2016_v5 = vpop.eup %2015 }
 0xec9   : > { %1167 = vrot.lane.b32.xlu0 %v2016_v5, %s2067_s15  ;;  %v1442_v5 = vsub.f32 1.0, %v1756_v30 }
 0xeca   : > { %v2018_v8 = vpop.eup %2017 }
 0xecb   : > { %v1161_v37 = vadd.f32 1.0, %v2018_v8 }
 0xecd   : > { %1184 = vperm.xlu0 %1974, %v1740_v0   ;;  %2019 = vrcp.f32 %v1161_v37 }
 0xed7   : > { %v2020_v38 = vpop.eup %2019 }
 0xed8   : > { %v1165_v45 = vmul.f32 %v2020_v38, %v1071_v44 }
 0xf3b   : > { %v1168_v39 = vpop.permute.xlu0 %1167 }
 0xf3c   : > { %v1170_v40 = vmul.f32 %v2020_v38, %v1168_v39 }
 0xf3e   : > { %1172 = vrot.lane.b32.xlu1 %v1170_v40, %s2068_s24 }
 0xf42   : > { %1191 = vperm.xlu1 %1973, %v1188_v41  }
 0xf4c   : > { %v1185_v49 = vpop.permute.xlu0 %1184 }
 0xfb0   : > { %v1173_v46 = vpop.permute.xlu1 %1172 }
 0xfb1   : > { %v1175_v47 = vadd.f32 %v1173_v46, %v1165_v45 }
 0xfb3   : > { %2021 = vtanh.f32 %v1175_v47  ;;  %v1196_v11 = vmul.f32 %v1185_v49, %v1175_v47 }
 0xfbd   : > { %v2022_v48 = vpop.eup %2021 }
 0xfbe   : > { %1178 = vrot.lane.b32.xlu0 %v2022_v48, %s2067_s15 }
 0xfc1   : > { %v1192_v50 = vpop.permute.xlu1 %1191 }
 0xfc2   : > { %v1194_v53 = vmul.f32 %v1192_v50, %v1068_v31  ;;  %v1197_v10 = vmul.f32 %v1192_v50, %v1071_v44 }
 0xfc4   : > { %v1198_v12 = vadd.f32 %v1197_v10, %v1196_v11 }
0x1030   : > { %v1179_v51 = vpop.permute.xlu0 %1178 }
0x1031   : > { %v1181_v52 = vmul.f32 %v2020_v38, %v1179_v51 }
0x1033   : > { %v1187_v54 = vmul.f32 %v1185_v49, %v1181_v52 }
0x1035   : > { %v1195_v55 = vadd.f32 %v1194_v53, %v1187_v54 }
0x1037   : > { %1200 = vrot.lane.b32.xlu1 %v1195_v55, %s2068_s24 }
0x10a9   : > { %v1201_v56 = vpop.permute.xlu1 %1200 }
0x10aa   : > { %1744 = vst.msk [vmem:[%s1606_s27 + $0xa] sm:$0x3] %vm421_vm1, %v1201_v56  ;;  %1881 = vmatmul.mubr.msk.f32.vlgmr.msra.gmra.mrb[6].mxu0 %vm437_vm2, %v1201_v56 }
0x117d   : > { %v1280_v58 = vpop.f32.mrb[6].mxu0 }
0x117e   : > { %v1284_v59 = vadd.f32 %v1746_v57, %v1280_v58  ;;  %v1882_v60 = vpop.f32.mrb[7].mxu0 }
0x1180   : > { %2023 = vtanh.f32 %v1284_v59  ;;  %v1750_v63 = vmul.f32 -1.442695, %v1284_v59 }
0x1182   : > { %2025 = vpow2.f32 %v1750_v63 }
0x118a   : > { %v2024_v61 = vpop.eup %2023 }
0x118b   : > { %1294 = vrot.lane.b32.xlu0 %v2024_v61, %s2067_s15 }
0x118c   : > { %v2026_v2 = vpop.eup %2025 }
0x118d   : > { %v1288_v3 = vadd.f32 1.0, %v2026_v2 }
0x118f   : > { %1311 = vperm.xlu0 %1974, %v1748_v62   ;;  %2027 = vrcp.f32 %v1288_v3 }
0x1199   : > { %v2028_v4 = vpop.eup %2027 }
0x119a   : > { %v1292_v13 = vmul.f32 %v2028_v4, %v1198_v12 }
0x11fd   : > { %v1295_v6 = vpop.permute.xlu0 %1294 }
0x11fe   : > { %v1297_v7 = vmul.f32 %v2028_v4, %v1295_v6 }
0x1200   : > { %1299 = vrot.lane.b32.xlu1 %v1297_v7, %s2068_s24 }
0x1204   : > { %1318 = vperm.xlu1 %1973, %v1315_v9  }
0x120e   : > { %v1312_v17 = vpop.permute.xlu0 %1311 }
0x1272   : > { %v1300_v14 = vpop.permute.xlu1 %1299 }
0x1273   : > { %v1302_v15 = vadd.f32 %v1300_v14, %v1292_v13 }
0x1275   : > { %2029 = vtanh.f32 %v1302_v15  ;;  %v1323_v1 = vmul.f32 %v1312_v17, %v1302_v15 }
0x127f   : > { %v2030_v16 = vpop.eup %2029 }
0x1280   : > { %1305 = vrot.lane.b32.xlu0 %v2030_v16, %s2067_s15 }
0x1283   : > { %v1319_v18 = vpop.permute.xlu1 %1318 }
0x1284   : > { %v1321_v21 = vmul.f32 %v1319_v18, %v1195_v55  ;;  %v1324_v0 = vmul.f32 %v1319_v18, %v1198_v12 }
0x1286   : > { %v1325_v8 = vadd.f32 %v1324_v0, %v1323_v1 }
0x12f2   : > { %v1306_v19 = vpop.permute.xlu0 %1305 }
0x12f3   : > { %v1308_v20 = vmul.f32 %v2028_v4, %v1306_v19 }
0x12f5   : > { %v1314_v22 = vmul.f32 %v1312_v17, %v1308_v20 }
0x12f7   : > { %v1322_v23 = vadd.f32 %v1321_v21, %v1314_v22 }
0x12f9   : > { %1327 = vrot.lane.b32.xlu1 %v1322_v23, %s2068_s24 }
0x136b   : > { %v1328_v24 = vpop.permute.xlu1 %1327 }
0x136c   : > { %1752 = vst.msk [vmem:[%s1618_s22 + $0xc] sm:$0x3] %vm421_vm1, %v1328_v24  ;;  %1892 = vmatmul.mubr.msk.f32.vlgmr.msra.gmra.mrb[6].mxu1 %vm437_vm2, %v1328_v24 }
0x143f   : > { %v1407_v26 = vpop.f32.mrb[6].mxu1 }
0x1440   : > { %v1411_v27 = vadd.f32 %v1754_v25, %v1407_v26  ;;  %v1893_v28 = vpop.f32.mrb[7].mxu1 }
0x1442   : > { %2031 = vtanh.f32 %v1411_v27  ;;  %v1758_v31 = vmul.f32 -1.442695, %v1411_v27 }
0x1444   : > { %2033 = vpow2.f32 %v1758_v31 }
0x144c   : > { %v2032_v29 = vpop.eup %2031 }
0x144d   : > { %1421 = vrot.lane.b32.xlu0 %v2032_v29, %s2067_s15 }
0x144e   : > { %v2034_v32 = vpop.eup %2033 }
0x144f   : > { %v1415_v33 = vadd.f32 1.0, %v2034_v32 }
0x1451   : > { %1438 = vperm.xlu0 %1974, %v1756_v30   ;;  %2035 = vrcp.f32 %v1415_v33 }
0x145b   : > { %v2036_v34 = vpop.eup %2035 }
0x145c   : > { %v1419_v37 = vmul.f32 %v2036_v34, %v1325_v8 }
0x14bf   : > { %v1422_v35 = vpop.permute.xlu0 %1421 }
0x14c0   : > { %v1424_v36 = vmul.f32 %v2036_v34, %v1422_v35 }
0x14c2   : > { %1426 = vrot.lane.b32.xlu1 %v1424_v36, %s2068_s24 }
0x14c6   : > { %1445 = vperm.xlu1 %1973, %v1442_v5  }
0x14d0   : > { %v1439_v41 = vpop.permute.xlu0 %1438 }
0x1534   : > { %v1427_v38 = vpop.permute.xlu1 %1426 }
0x1535   : > { %v1429_v39 = vadd.f32 %v1427_v38, %v1419_v37 }
0x1537   : > { %2037 = vtanh.f32 %v1429_v39  ;;  %v1450_v43 = vmul.f32 %v1439_v41, %v1429_v39 }
0x1541   : > { %v2038_v40 = vpop.eup %2037 }
0x1542   : > { %1432 = vrot.lane.b32.xlu0 %v2038_v40, %s2067_s15 }
0x1545   : > { %v1446_v42 = vpop.permute.xlu1 %1445 }
0x1546   : > { %v1451_v44 = vmul.f32 %v1446_v42, %v1325_v8  ;;  %v1448_v48 = vmul.f32 %v1446_v42, %v1322_v23 }
0x1548   : > { %v1452_v45 = vadd.f32 %v1451_v44, %v1450_v43 }
0x154a   : > { %1461 = vrot.lane.b32.xlu0 %v1452_v45, %s2069_s25 }
0x15b4   : > { %v1433_v46 = vpop.permute.xlu0 %1432 }
0x15b5   : > { %v1435_v47 = vmul.f32 %v2036_v34, %v1433_v46 }
0x15b7   : > { %v1441_v49 = vmul.f32 %v1439_v41, %v1435_v47 }
0x15b9   : > { %v1449_v50 = vadd.f32 %v1448_v48, %v1441_v49 }
0x15bb   : > { %1454 = vrot.lane.b32.xlu1 %v1449_v50, %s2068_s24 }
0x15bc   : > { %v1462_v51 = vpop.permute.xlu0 %1461 }
0x15bd   : > { %1464 = vst.msk [vmem:[#allocation3] sm:$0x3] %vm421_vm1, %v1462_v51 }
0x162d   : > { %v1455_v52 = vpop.permute.xlu1 %1454 }
0x162e   : > { %1760 = vst.msk [vmem:[%s1630_s18 + $0xe] sm:$0x3] %vm421_vm1, %v1455_v52  ;;  %1459 = vst.msk [vmem:[#allocation2] sm:$0x3] %vm421_vm1, %v1455_v52 }
0x162f PF: > { %s15_s20 = sadd.s32 1, %s2061_s20   ;;  %s2361_s18 = smov %s2057_s19 }
0x1630   : > { %p12_p5 = scmp.ge.s32.totalorder %s15_s20, 4   ;;  %s2362_s19 = smov %s2364_s21 }
0x1632   :  { %14 = sbr.rel (!%p12_p5) target bundleno = 2 (0x2), region = 110 }

</bundles_post_ra>
